<compile_context>
chip_gen: v7x
topology: tpu7x:2x2x1
jax: 0.10.0
libtpu: 0.0.40
codegen_flags: <defaults>
</compile_context>

<pallas_src>
import jax
import jax.numpy as jnp
from jax.experimental import pallas as pl
from jax.experimental.pallas import tpu as pltpu

NEG_INF = float("-inf")


def _leaky_relu(x):
    # torch.nn.functional.leaky_relu default negative_slope = 0.01
    return jnp.where(x > 0, x, 0.01 * x)


def predict_kernel(nh_ref, enc_ref, emask_ref, nemb_ref, nmask_ref, fin_ref,
                   wnh_ref, awe_ref, ab_ref, asc_ref,
                   wctx_ref, swn_ref, sb_ref, ssc_ref, ob_ref,
                   score_ref, ctx_ref):
    neg_inf = jnp.float32(NEG_INF)

    nh = nh_ref[...]                                   # (Bt, H)    bf16
    enc = enc_ref[...]                                 # (Bt, S, H) bf16
    Bt, S, H = enc.shape
    O = ob_ref.shape[-1]

    # ----- fused shared-LHS matmul: nh @ [Wa_query | Ws_hidden | Wop_hidden] -----
    nh_proj = jnp.dot(nh, wnh_ref[...], preferred_element_type=jnp.float32)   # (Bt, 2H+O)
    hq = nh_proj[:, :H]                # attention query projection
    shc = nh_proj[:, H:2 * H]          # ScoreModel hidden part
    op_score = nh_proj[:, 2 * H:]      # score_op hidden part

    # ---------------- Attention over encoder outputs ----------------
    he = jnp.dot(enc.reshape(Bt * S, H), awe_ref[...],
                 preferred_element_type=jnp.float32).reshape(Bt, S, H)
    h = _leaky_relu(hq[:, None, :] + he + ab_ref[...][None])                  # f32
    att = jnp.sum(h * asc_ref[...][None], axis=-1)                            # (Bt, S)

    att = jnp.where(emask_ref[...] == 0, neg_inf, att)
    att = att - jnp.max(att, axis=-1, keepdims=True)
    e = jnp.exp(att)
    # divide -> EUP reciprocal (frees the VPU slot); attn stays f32
    attn = e * pl.reciprocal(jnp.sum(e, axis=-1, keepdims=True), approx=True)

    # context = attn-weighted sum of encoder outputs, all f32
    ctx = jnp.einsum("bqs,bsh->bqh", attn[:, None, :], enc.astype(jnp.float32),
                     preferred_element_type=jnp.float32)[:, 0, :]             # (Bt, H)
    ctx_ref[...] = ctx

    # ----- fused shared-LHS matmul: ctx @ [Ws_context | Wop_context] -----
    ctx_proj = jnp.dot(ctx.astype(enc.dtype), wctx_ref[...],
                       preferred_element_type=jnp.float32)                    # (Bt, H+O)
    shc = shc + ctx_proj[:, :H]
    op_score = op_score + ctx_proj[:, H:] + ob_ref[...]                       # (Bt, O)

    # ---------------- ScoreModel over number-candidate embeddings ----------------
    nemb = nemb_ref[...]                                                      # (Bt, Nc, H)
    Nc = nemb.shape[1]
    sn = jnp.dot(nemb.reshape(Bt * Nc, H), swn_ref[...],
                 preferred_element_type=jnp.float32).reshape(Bt, Nc, H)
    sh = _leaky_relu(shc[:, None, :] + sn + sb_ref[...][None])
    num_score = jnp.sum(sh * ssc_ref[...][None], axis=-1)                     # (Bt, Nc)
    num_score = jnp.where(nmask_ref[...] == 0, neg_inf, num_score)

    # ---------------- log-softmax + finished / padding masks ----------------
    full = jnp.concatenate([op_score, num_score], axis=-1)                    # (Bt, O+Nc)
    m = jnp.max(full, axis=-1, keepdims=True)
    lse = jnp.log(jnp.sum(jnp.exp(full - m), axis=-1, keepdims=True)) + m
    logp = full - lse

    fin = fin_ref[...]                                                        # (Bt, 1)
    # matches torch exactly: (1 - finished) * -inf  (NaN when finished == 1)
    pad_score = (1.0 - fin) * neg_inf
    logp = jnp.where(fin == 1.0, neg_inf, logp)                               # masked_fill

    C = score_ref.shape[-1]
    K = 1 + logp.shape[-1]
    if K > C:
        # only padded (masked, -inf) num-candidate columns can be dropped here
        logp = logp[:, :C - 1]
        K = C
    parts = [pad_score, logp]
    if C > K:
        parts.append(jnp.full((Bt, C - K), neg_inf, dtype=jnp.float32))       # pad_empty_num
    # single full-width, lane-dense store of the output block
    score_ref[...] = jnp.concatenate(parts, axis=-1)


def init_params(key, hidden_dim, op_size):
    """Deterministic synthetic parameters in the PyTorch (torch.nn.Linear) layout."""
    H = hidden_dim
    ks = jax.random.split(key, 8)

    def u(k, shape, fan_in):
        b = 1.0 / (fan_in ** 0.5)
        return jax.random.uniform(k, shape, jnp.float32, -b, b)

    return dict(
        attn_w_w=u(ks[0], (H, 2 * H), 2 * H),     # Attention.w.weight
        attn_w_b=u(ks[1], (H,), 2 * H),           # Attention.w.bias
        attn_sc_w=u(ks[2], (1, H), H),            # Attention.score.weight (no bias)
        sn_w_w=u(ks[3], (H, 3 * H), 3 * H),       # ScoreModel.w.weight
        sn_w_b=u(ks[4], (H,), 3 * H),             # ScoreModel.w.bias
        sn_sc_w=u(ks[5], (1, H), H),              # ScoreModel.score.weight (no bias)
        op_w=u(ks[6], (op_size, 2 * H), 2 * H),   # score_op.weight
        op_b=u(ks[7], (op_size,), 2 * H),         # score_op.bias
    )


def kernel_params(raw):
    """Split / transpose / fuse torch-layout weights into the kernel layout."""
    H = raw["attn_w_w"].shape[0]
    awq = raw["attn_w_w"][:, :H].T           # Attention.w  query half      (H, H)
    awe = raw["attn_w_w"][:, H:].T           # Attention.w  encoder half    (H, H)
    swh = raw["sn_w_w"][:, :H].T             # ScoreModel.w hidden part     (H, H)
    swc = raw["sn_w_w"][:, H:2 * H].T        # ScoreModel.w context part    (H, H)
    swn = raw["sn_w_w"][:, 2 * H:].T         # ScoreModel.w num-emb part    (H, H)
    owh = raw["op_w"][:, :H].T               # score_op     hidden part     (H, O)
    owc = raw["op_w"][:, H:].T               # score_op     context part    (H, O)
    return dict(
        # one wide-N matmul per shared LHS
        w_nh=jnp.concatenate([awq, swh, owh], axis=1),   # (H, 2H + O)
        w_ctx=jnp.concatenate([swc, owc], axis=1),       # (H, H + O)
        awe=awe, swn=swn,
        ab=raw["attn_w_b"].reshape(1, H), asc=raw["attn_sc_w"],
        sb=raw["sn_w_b"].reshape(1, H), ssc=raw["sn_sc_w"],
        ob=raw["op_b"].reshape(1, -1),
    )


def _round_up(x, m):
    return (x + m - 1) // m * m


def _vmem_limit_bytes():
    """Generation-aware scoped-VMEM budget (v5e/v6e: 128 MiB phys, v7x: 64 MiB)."""
    try:
        kind = jax.devices()[0].device_kind.lower()
    except Exception:
        kind = ""
    if "v5" in kind or "v6" in kind:
        return 64 * 1024 * 1024
    return 48 * 1024 * 1024


def _pick_batch_tile(B, S, Nc, H, C, O, vmem_limit):
    """Largest multiple-of-8 batch tile dividing B that fits the VMEM budget."""
    # double-buffered input/output blocks (bf16 data, i32/f32 masks, f32 outputs)
    io_row = 2 * (2 * H * (1 + S + Nc) + 4 * (S + Nc + 1) + 4 * (C + H))
    # f32 in-kernel activation temporaries (he/h, sn/sh, projections, attn)
    tmp_row = 8 * H * (S + Nc) + 4 * (4 * H + 2 * (O + S + Nc))
    per_row = io_row + tmp_row
    # double-buffered weight blocks
    w_bytes = 2 * (2 * H * ((2 * H + O) + H + (H + O) + H) + 4 * (4 * H + O))
    budget = max(vmem_limit // 2 - w_bytes, per_row)
    target = max(8, min(B, budget // per_row))
    if B >= 16:
        target = min(target, B // 2)        # >= 2 grid steps: both v7x TCs get work
    bt = 8
    for d in range(8, B + 1, 8):
        if B % d == 0 and d <= target:
            bt = d
    return bt


def predict_model(node_hidden, encoder_outputs, encoder_masks,
                  num_embedding, num_mask, finished_mask,
                  params, class_size):
    # TODO(synk): nn.Dropout(p=0.4) is stochastic; implemented as eval-mode identity.
    B, H = node_hidden.shape
    S0 = encoder_outputs.shape[1]
    Nc0 = num_embedding.shape[1]
    O = params["ob"].shape[-1]
    C = class_size
    assert C >= 1 + O + Nc0, "class_size smaller than 1 + op_size + num candidates"

    # Pad batch / seq / candidate axes to sublane multiples (8). Padded rows are
    # sliced off at the end; padded seq/candidate positions are masked out and
    # produce -inf, identical to the pad_empty_num columns.
    Bp, Sp, Np = _round_up(B, 8), _round_up(S0, 8), _round_up(Nc0, 8)

    def pad_to(a, shape):
        return jnp.pad(a, [(0, t - s) for s, t in zip(a.shape, shape)])

    bf16 = lambda a: a.astype(jnp.bfloat16)
    f32 = lambda a: a.astype(jnp.float32)

    nh = pad_to(bf16(node_hidden), (Bp, H))
    enc = pad_to(bf16(encoder_outputs), (Bp, Sp, H))
    emask = pad_to(encoder_masks.astype(jnp.int32), (Bp, Sp))
    nemb = pad_to(bf16(num_embedding), (Bp, Np, H))
    nmask = pad_to(num_mask.astype(jnp.int32), (Bp, Np))
    fin = pad_to(f32(finished_mask).reshape(B, 1), (Bp, 1))

    vmem_limit = _vmem_limit_bytes()
    bt = _pick_batch_tile(Bp, Sp, Np, H, C, O, vmem_limit)
    grid = (Bp // bt,)

    args = (nh, enc, emask, nemb, nmask, fin,
            bf16(params["w_nh"]), bf16(params["awe"]), f32(params["ab"]), f32(params["asc"]),
            bf16(params["w_ctx"]), bf16(params["swn"]), f32(params["sb"]), f32(params["ssc"]),
            f32(params["ob"]))

    def row_spec(a):
        if a.ndim == 2:
            return pl.BlockSpec((bt,) + a.shape[1:], lambda i: (i, 0))
        return pl.BlockSpec((bt,) + a.shape[1:], lambda i: (i, 0, 0))

    def w_spec(a):
        return pl.BlockSpec(a.shape, lambda i: (0, 0))

    in_specs = [row_spec(a) for a in args[:6]] + [w_spec(a) for a in args[6:]]
    out_specs = (pl.BlockSpec((bt, C), lambda i: (i, 0)),
                 pl.BlockSpec((bt, H), lambda i: (i, 0)))
    out_shape = (jax.ShapeDtypeStruct((Bp, C), jnp.float32),
                 jax.ShapeDtypeStruct((Bp, H), jnp.float32))

    flops = 2 * Bp * (H * (2 * H + O) + Sp * H * H + 2 * Sp * H
                      + H * (H + O) + Np * H * H + Np * H)
    bytes_accessed = (sum(int(a.size) * a.dtype.itemsize for a in args)
                      + Bp * (C + H) * 4)
    cost = pl.CostEstimate(flops=int(flops),
                           transcendentals=int(Bp * (Sp + O + Np + 2)),
                           bytes_accessed=int(bytes_accessed))

    fn = pl.pallas_call(
        predict_kernel,
        out_shape=out_shape,
        grid=grid,
        in_specs=in_specs,
        out_specs=out_specs,
        compiler_params=pltpu.CompilerParams(
            dimension_semantics=("parallel",),      # shard batch tiles across TCs
            vmem_limit_bytes=vmem_limit),
        cost_estimate=cost,
    )
    score, ctx = fn(*args)
    return score[:B], ctx[:B]


def reference_forward(nh, enc, emask, nemb, nmask, fin, raw, class_size):
    """Pure-JAX f32 reference mirroring the torch module in eval mode."""
    B, S, H = enc.shape
    Nc = nemb.shape[1]
    q = jnp.broadcast_to(nh[:, None, :], (B, S, H))
    qc = jnp.concatenate([q, enc], axis=-1)
    h = jax.nn.leaky_relu(qc @ raw["attn_w_w"].T + raw["attn_w_b"], 0.01)
    att = (h @ raw["attn_sc_w"].T)[..., 0]
    att = jnp.where(emask == 0, -jnp.inf, att)
    attn = jax.nn.softmax(att, axis=-1)
    ctx = jnp.einsum("bs,bsh->bh", attn, enc)

    hc = jnp.concatenate([nh, ctx], axis=-1)
    op_score = hc @ raw["op_w"].T + raw["op_b"]
    hc3 = jnp.broadcast_to(hc[:, None, :], (B, Nc, 2 * H))
    sh = jnp.concatenate([hc3, nemb], axis=-1)
    sh = jax.nn.leaky_relu(sh @ raw["sn_w_w"].T + raw["sn_w_b"], 0.01)
    num_score = (sh @ raw["sn_sc_w"].T)[..., 0]
    num_score = jnp.where(nmask == 0, -jnp.inf, num_score)

    full = jnp.concatenate([op_score, num_score], axis=-1)
    logp = jax.nn.log_softmax(full, axis=-1)
    finu = fin.reshape(B, 1)
    pad_score = (1.0 - finu) * (-jnp.inf)
    logp = jnp.where(finu == 1.0, -jnp.inf, logp)
    pad = jnp.full((B, class_size - 1 - logp.shape[-1]), -jnp.inf, jnp.float32)
    score = jnp.concatenate([pad_score, logp, pad], axis=-1)
    return score, ctx


if __name__ == "__main__":
    B, H, S, Nc = 2, 32, 8, 4
    op_size, class_size = 5, 16      # 1 (pad) + op_size + Nc = 10, pad_empty_num = 6

    key = jax.random.PRNGKey(0)
    k1, k2, k3, kp = jax.random.split(key, 4)
    node_hidden = jax.random.normal(k1, (B, H), jnp.float32)
    encoder_outputs = jax.random.normal(k2, (B, S, H), jnp.float32)
    encoder_masks = jnp.array([[1, 1, 1, 1, 1, 0, 0, 0],
                               [1, 1, 1, 1, 1, 1, 1, 0]], jnp.int32)
    num_embedding = jax.random.normal(k3, (B, Nc, H), jnp.float32)
    num_mask = jnp.array([[1, 1, 1, 0],
                          [1, 1, 0, 0]], jnp.int32)
    finished_mask = jnp.array([0.0, 1.0], jnp.float32)

    raw = init_params(kp, H, op_size)
    params = kernel_params(raw)

    score, context = predict_model(node_hidden, encoder_outputs, encoder_masks,
                                   num_embedding, num_mask, finished_mask,
                                   params, class_size)
    jax.block_until_ready((score, context))
    assert score.shape == (B, class_size)
    assert context.shape == (B, H)

    # correctness check vs f32 reference (loose tolerance for bf16 MXU operands)
    ref_score, ref_ctx = reference_forward(node_hidden, encoder_outputs, encoder_masks,
                                           num_embedding, num_mask, finished_mask,
                                           raw, class_size)
    assert bool(jnp.all(jnp.isnan(score) == jnp.isnan(ref_score)))
    assert bool(jnp.all((score == -jnp.inf) == (ref_score == -jnp.inf)))
    finite = jnp.isfinite(ref_score)
    assert bool(jnp.allclose(jnp.where(finite, score, 0.0),
                             jnp.where(finite, ref_score, 0.0),
                             atol=2.5e-1, rtol=1e-1))
    assert bool(jnp.allclose(context, ref_ctx, atol=1e-1, rtol=5e-2))
    print("KERNEL_OK")
</pallas_src>

<mosaic_0001>
module attributes {stable_mosaic.version = 11 : i64} {
  func.func @predict_kernel(%arg0: i32, %arg1: memref<8x32xbf16, #tpu.memory_space<vmem>>, %arg2: memref<8x8x32xbf16, #tpu.memory_space<vmem>>, %arg3: memref<8x8xi32, #tpu.memory_space<vmem>>, %arg4: memref<8x8x32xbf16, #tpu.memory_space<vmem>>, %arg5: memref<8x8xi32, #tpu.memory_space<vmem>>, %arg6: memref<8x1xf32, #tpu.memory_space<vmem>>, %arg7: memref<32x69xbf16, #tpu.memory_space<vmem>>, %arg8: memref<32x32xbf16, #tpu.memory_space<vmem>>, %arg9: memref<1x32xf32, #tpu.memory_space<vmem>>, %arg10: memref<1x32xf32, #tpu.memory_space<vmem>>, %arg11: memref<32x37xbf16, #tpu.memory_space<vmem>>, %arg12: memref<32x32xbf16, #tpu.memory_space<vmem>>, %arg13: memref<1x32xf32, #tpu.memory_space<vmem>>, %arg14: memref<1x32xf32, #tpu.memory_space<vmem>>, %arg15: memref<1x5xf32, #tpu.memory_space<vmem>>, %arg16: memref<8x16xf32, #tpu.memory_space<vmem>>, %arg17: memref<8x32xf32, #tpu.memory_space<vmem>>) attributes {dimension_semantics = [#tpu.dimension_semantics<parallel>], iteration_bounds = array<i64: 1>, scalar_prefetch = 0 : i64, scratch_operands = 0 : i64, tpu.core_type = #tpu.core_type<tc>, window_params = [{transform_indices = @transform_0, window_bounds = array<i64: 8, 32>}, {transform_indices = @transform_1, window_bounds = array<i64: 8, 8, 32>}, {transform_indices = @transform_2, window_bounds = array<i64: 8, 8>}, {transform_indices = @transform_3, window_bounds = array<i64: 8, 8, 32>}, {transform_indices = @transform_4, window_bounds = array<i64: 8, 8>}, {transform_indices = @transform_5, window_bounds = array<i64: 8, 1>}, {pipeline_mode = #tpu.pipeline_mode<synchronous>, transform_indices = @transform_6, window_bounds = array<i64: 32, 69>}, {pipeline_mode = #tpu.pipeline_mode<synchronous>, transform_indices = @transform_7, window_bounds = array<i64: 32, 32>}, {pipeline_mode = #tpu.pipeline_mode<synchronous>, transform_indices = @transform_8, window_bounds = array<i64: 1, 32>}, {pipeline_mode = #tpu.pipeline_mode<synchronous>, transform_indices = @transform_9, window_bounds = array<i64: 1, 32>}, {pipeline_mode = #tpu.pipeline_mode<synchronous>, transform_indices = @transform_10, window_bounds = array<i64: 32, 37>}, {pipeline_mode = #tpu.pipeline_mode<synchronous>, transform_indices = @transform_11, window_bounds = array<i64: 32, 32>}, {pipeline_mode = #tpu.pipeline_mode<synchronous>, transform_indices = @transform_12, window_bounds = array<i64: 1, 32>}, {pipeline_mode = #tpu.pipeline_mode<synchronous>, transform_indices = @transform_13, window_bounds = array<i64: 1, 32>}, {pipeline_mode = #tpu.pipeline_mode<synchronous>, transform_indices = @transform_14, window_bounds = array<i64: 1, 5>}, {transform_indices = @transform_15, window_bounds = array<i64: 8, 16>}, {transform_indices = @transform_16, window_bounds = array<i64: 8, 32>}]} {
    %c0 = arith.constant 0 : index
    %c0_0 = arith.constant 0 : index
    %0 = vector.load %arg1[%c0, %c0_0] : memref<8x32xbf16, #tpu.memory_space<vmem>>, vector<8x32xbf16>
    %c0_1 = arith.constant 0 : index
    %c0_2 = arith.constant 0 : index
    %c0_3 = arith.constant 0 : index
    %1 = vector.load %arg2[%c0_1, %c0_2, %c0_3] : memref<8x8x32xbf16, #tpu.memory_space<vmem>>, vector<8x8x32xbf16>
    %c0_4 = arith.constant 0 : index
    %c0_5 = arith.constant 0 : index
    %2 = vector.load %arg7[%c0_4, %c0_5] : memref<32x69xbf16, #tpu.memory_space<vmem>>, vector<32x69xbf16>
    %cst = arith.constant dense<0.000000e+00> : vector<8x69xf32>
    %3 = tpu.matmul %0, %2, %cst {dimension_numbers = #tpu.dot_dimension_numbers<[1], [0], [0], [1], [0, 0, 1, 1], [], []>} : vector<8x32xbf16>, vector<32x69xbf16>, vector<8x69xf32> -> vector<8x69xf32>
    %4 = vector.extract_strided_slice %3 {offsets = [0, 0], sizes = [8, 32], strides = [1, 1]} : vector<8x69xf32> to vector<8x32xf32>
    %5 = vector.extract_strided_slice %3 {offsets = [0, 32], sizes = [8, 32], strides = [1, 1]} : vector<8x69xf32> to vector<8x32xf32>
    %6 = vector.extract_strided_slice %3 {offsets = [0, 64], sizes = [8, 5], strides = [1, 1]} : vector<8x69xf32> to vector<8x5xf32>
    %7 = vector.shape_cast %1 : vector<8x8x32xbf16> to vector<64x32xbf16>
    %c0_6 = arith.constant 0 : index
    %c0_7 = arith.constant 0 : index
    %8 = vector.load %arg8[%c0_6, %c0_7] : memref<32x32xbf16, #tpu.memory_space<vmem>>, vector<32x32xbf16>
    %cst_8 = arith.constant dense<0.000000e+00> : vector<64x32xf32>
    %9 = tpu.matmul %7, %8, %cst_8 {dimension_numbers = #tpu.dot_dimension_numbers<[1], [0], [0], [1], [0, 0, 1, 1], [], []>} : vector<64x32xbf16>, vector<32x32xbf16>, vector<64x32xf32> -> vector<64x32xf32>
    %10 = vector.shape_cast %9 : vector<64x32xf32> to vector<8x8x32xf32>
    %11 = vector.shape_cast %4 : vector<8x32xf32> to vector<8x1x32xf32>
    %12 = vector.broadcast %11 : vector<8x1x32xf32> to vector<8x8x32xf32>
    %13 = arith.addf %12, %10 : vector<8x8x32xf32>
    %c0_9 = arith.constant 0 : index
    %c0_10 = arith.constant 0 : index
    %14 = vector.load %arg9[%c0_9, %c0_10] : memref<1x32xf32, #tpu.memory_space<vmem>>, vector<1x32xf32>
    %15 = vector.shape_cast %14 : vector<1x32xf32> to vector<1x1x32xf32>
    %16 = vector.broadcast %15 : vector<1x1x32xf32> to vector<8x8x32xf32>
    %17 = arith.addf %13, %16 : vector<8x8x32xf32>
    %cst_11 = arith.constant 0.000000e+00 : f32
    %18 = vector.broadcast %cst_11 : f32 to vector<8x8x32xf32>
    %19 = arith.cmpf ogt, %17, %18 : vector<8x8x32xf32>
    %cst_12 = arith.constant 0.00999999977 : f32
    %20 = vector.broadcast %cst_12 : f32 to vector<8x8x32xf32>
    %21 = arith.mulf %20, %17 : vector<8x8x32xf32>
    %22 = arith.select %19, %17, %21 : vector<8x8x32xi1>, vector<8x8x32xf32>
    %c0_13 = arith.constant 0 : index
    %c0_14 = arith.constant 0 : index
    %23 = vector.load %arg10[%c0_13, %c0_14] : memref<1x32xf32, #tpu.memory_space<vmem>>, vector<1x32xf32>
    %24 = vector.shape_cast %23 : vector<1x32xf32> to vector<1x1x32xf32>
    %25 = vector.broadcast %24 : vector<1x1x32xf32> to vector<8x8x32xf32>
    %26 = arith.mulf %22, %25 : vector<8x8x32xf32>
    %cst_15 = arith.constant dense<0.000000e+00> : vector<8x8xf32>
    %27 = vector.multi_reduction <add>, %26, %cst_15 [2] : vector<8x8x32xf32> to vector<8x8xf32>
    %c0_16 = arith.constant 0 : index
    %c0_17 = arith.constant 0 : index
    %28 = vector.load %arg3[%c0_16, %c0_17] : memref<8x8xi32, #tpu.memory_space<vmem>>, vector<8x8xi32>
    %c0_i32 = arith.constant 0 : i32
    %29 = vector.broadcast %c0_i32 : i32 to vector<8x8xi32>
    %30 = arith.cmpi eq, %28, %29 : vector<8x8xi32>
    %cst_18 = arith.constant 0xFF800000 : f32
    %31 = vector.broadcast %cst_18 : f32 to vector<8x8xf32>
    %32 = arith.select %30, %31, %27 : vector<8x8xi1>, vector<8x8xf32>
    %cst_19 = arith.constant dense<0xFF800000> : vector<8xf32>
    %33 = vector.multi_reduction <maximumf>, %32, %cst_19 [1] : vector<8x8xf32> to vector<8xf32>
    %34 = vector.shape_cast %33 : vector<8xf32> to vector<8x1xf32>
    %35 = vector.broadcast %34 : vector<8x1xf32> to vector<8x8xf32>
    %36 = arith.subf %32, %35 : vector<8x8xf32>
    %37 = math.exp %36 : vector<8x8xf32>
    %cst_20 = arith.constant dense<0.000000e+00> : vector<8xf32>
    %38 = vector.multi_reduction <add>, %37, %cst_20 [1] : vector<8x8xf32> to vector<8xf32>
    %39 = vector.shape_cast %38 : vector<8xf32> to vector<8x1xf32>
    %40 = tpu.reciprocal %39 {approx = true} : vector<8x1xf32> -> vector<8x1xf32>
    %41 = vector.broadcast %40 : vector<8x1xf32> to vector<8x8xf32>
    %42 = arith.mulf %37, %41 : vector<8x8xf32>
    %43 = vector.shape_cast %42 : vector<8x8xf32> to vector<8x1x8xf32>
    %44 = arith.extf %1 : vector<8x8x32xbf16> to vector<8x8x32xf32>
    "tpu.trace_start"() <{level = 10 : i32, message = "bqs,bsh->bqh"}> : () -> ()
    %cst_21 = arith.constant dense<0.000000e+00> : vector<8x1x32xf32>
    %45 = tpu.matmul %43, %44, %cst_21 {dimension_numbers = #tpu.dot_dimension_numbers<[2], [1], [1], [2], [0, 0, 0, 1, 1, 2], [0], [0]>} : vector<8x1x8xf32>, vector<8x8x32xf32>, vector<8x1x32xf32> -> vector<8x1x32xf32>
    "tpu.trace_stop"() : () -> ()
    %46 = vector.shape_cast %45 : vector<8x1x32xf32> to vector<8x32xf32>
    %c0_22 = arith.constant 0 : index
    %c0_23 = arith.constant 0 : index
    %47 = vector.load %arg17[%c0_22, %c0_23] : memref<8x32xf32, #tpu.memory_space<vmem>>, vector<8x32xf32>
    tpu.vector_store %arg17[%c0_22, %c0_23], %46 {strides = array<i32>} : memref<8x32xf32, #tpu.memory_space<vmem>>, vector<8x32xf32>,
    %48 = arith.truncf %46 : vector<8x32xf32> to vector<8x32xbf16>
    %c0_24 = arith.constant 0 : index
    %c0_25 = arith.constant 0 : index
    %49 = vector.load %arg11[%c0_24, %c0_25] : memref<32x37xbf16, #tpu.memory_space<vmem>>, vector<32x37xbf16>
    %cst_26 = arith.constant dense<0.000000e+00> : vector<8x37xf32>
    %50 = tpu.matmul %48, %49, %cst_26 {dimension_numbers = #tpu.dot_dimension_numbers<[1], [0], [0], [1], [0, 0, 1, 1], [], []>} : vector<8x32xbf16>, vector<32x37xbf16>, vector<8x37xf32> -> vector<8x37xf32>
    %51 = vector.extract_strided_slice %50 {offsets = [0, 0], sizes = [8, 32], strides = [1, 1]} : vector<8x37xf32> to vector<8x32xf32>
    %52 = arith.addf %5, %51 : vector<8x32xf32>
    %53 = vector.extract_strided_slice %50 {offsets = [0, 32], sizes = [8, 5], strides = [1, 1]} : vector<8x37xf32> to vector<8x5xf32>
    %54 = arith.addf %6, %53 : vector<8x5xf32>
    %c0_27 = arith.constant 0 : index
    %c0_28 = arith.constant 0 : index
    %55 = vector.load %arg15[%c0_27, %c0_28] : memref<1x5xf32, #tpu.memory_space<vmem>>, vector<1x5xf32>
    %56 = vector.broadcast %55 : vector<1x5xf32> to vector<8x5xf32>
    %57 = arith.addf %54, %56 : vector<8x5xf32>
    %c0_29 = arith.constant 0 : index
    %c0_30 = arith.constant 0 : index
    %c0_31 = arith.constant 0 : index
    %58 = vector.load %arg4[%c0_29, %c0_30, %c0_31] : memref<8x8x32xbf16, #tpu.memory_space<vmem>>, vector<8x8x32xbf16>
    %59 = vector.shape_cast %58 : vector<8x8x32xbf16> to vector<64x32xbf16>
    %c0_32 = arith.constant 0 : index
    %c0_33 = arith.constant 0 : index
    %60 = vector.load %arg12[%c0_32, %c0_33] : memref<32x32xbf16, #tpu.memory_space<vmem>>, vector<32x32xbf16>
    %cst_34 = arith.constant dense<0.000000e+00> : vector<64x32xf32>
    %61 = tpu.matmul %59, %60, %cst_34 {dimension_numbers = #tpu.dot_dimension_numbers<[1], [0], [0], [1], [0, 0, 1, 1], [], []>} : vector<64x32xbf16>, vector<32x32xbf16>, vector<64x32xf32> -> vector<64x32xf32>
    %62 = vector.shape_cast %61 : vector<64x32xf32> to vector<8x8x32xf32>
    %63 = vector.shape_cast %52 : vector<8x32xf32> to vector<8x1x32xf32>
    %64 = vector.broadcast %63 : vector<8x1x32xf32> to vector<8x8x32xf32>
    %65 = arith.addf %64, %62 : vector<8x8x32xf32>
    %c0_35 = arith.constant 0 : index
    %c0_36 = arith.constant 0 : index
    %66 = vector.load %arg13[%c0_35, %c0_36] : memref<1x32xf32, #tpu.memory_space<vmem>>, vector<1x32xf32>
    %67 = vector.shape_cast %66 : vector<1x32xf32> to vector<1x1x32xf32>
    %68 = vector.broadcast %67 : vector<1x1x32xf32> to vector<8x8x32xf32>
    %69 = arith.addf %65, %68 : vector<8x8x32xf32>
    %cst_37 = arith.constant 0.000000e+00 : f32
    %70 = vector.broadcast %cst_37 : f32 to vector<8x8x32xf32>
    %71 = arith.cmpf ogt, %69, %70 : vector<8x8x32xf32>
    %cst_38 = arith.constant 0.00999999977 : f32
    %72 = vector.broadcast %cst_38 : f32 to vector<8x8x32xf32>
    %73 = arith.mulf %72, %69 : vector<8x8x32xf32>
    %74 = arith.select %71, %69, %73 : vector<8x8x32xi1>, vector<8x8x32xf32>
    %c0_39 = arith.constant 0 : index
    %c0_40 = arith.constant 0 : index
    %75 = vector.load %arg14[%c0_39, %c0_40] : memref<1x32xf32, #tpu.memory_space<vmem>>, vector<1x32xf32>
    %76 = vector.shape_cast %75 : vector<1x32xf32> to vector<1x1x32xf32>
    %77 = vector.broadcast %76 : vector<1x1x32xf32> to vector<8x8x32xf32>
    %78 = arith.mulf %74, %77 : vector<8x8x32xf32>
    %cst_41 = arith.constant dense<0.000000e+00> : vector<8x8xf32>
    %79 = vector.multi_reduction <add>, %78, %cst_41 [2] : vector<8x8x32xf32> to vector<8x8xf32>
    %c0_42 = arith.constant 0 : index
    %c0_43 = arith.constant 0 : index
    %80 = vector.load %arg5[%c0_42, %c0_43] : memref<8x8xi32, #tpu.memory_space<vmem>>, vector<8x8xi32>
    %c0_i32_44 = arith.constant 0 : i32
    %81 = vector.broadcast %c0_i32_44 : i32 to vector<8x8xi32>
    %82 = arith.cmpi eq, %80, %81 : vector<8x8xi32>
    %cst_45 = arith.constant 0xFF800000 : f32
    %83 = vector.broadcast %cst_45 : f32 to vector<8x8xf32>
    %84 = arith.select %82, %83, %79 : vector<8x8xi1>, vector<8x8xf32>
    %85 = tpu.concatenate %57, %84 in 1 : vector<8x5xf32>, vector<8x8xf32> -> vector<8x13xf32>
    %cst_46 = arith.constant dense<0xFF800000> : vector<8xf32>
    %86 = vector.multi_reduction <maximumf>, %85, %cst_46 [1] : vector<8x13xf32> to vector<8xf32>
    %87 = vector.shape_cast %86 : vector<8xf32> to vector<8x1xf32>
    %88 = vector.broadcast %87 : vector<8x1xf32> to vector<8x13xf32>
    %89 = arith.subf %85, %88 : vector<8x13xf32>
    %90 = math.exp %89 : vector<8x13xf32>
    %cst_47 = arith.constant dense<0.000000e+00> : vector<8xf32>
    %91 = vector.multi_reduction <add>, %90, %cst_47 [1] : vector<8x13xf32> to vector<8xf32>
    %92 = vector.shape_cast %91 : vector<8xf32> to vector<8x1xf32>
    %93 = math.log %92 : vector<8x1xf32>
    %94 = arith.addf %93, %87 : vector<8x1xf32>
    %95 = vector.broadcast %94 : vector<8x1xf32> to vector<8x13xf32>
    %96 = arith.subf %85, %95 : vector<8x13xf32>
    %c0_48 = arith.constant 0 : index
    %c0_49 = arith.constant 0 : index
    %97 = vector.load %arg6[%c0_48, %c0_49] : memref<8x1xf32, #tpu.memory_space<vmem>>, vector<8x1xf32>
    %cst_50 = arith.constant 1.000000e+00 : f32
    %98 = vector.broadcast %cst_50 : f32 to vector<8x1xf32>
    %99 = arith.subf %98, %97 : vector<8x1xf32>
    %cst_51 = arith.constant 0xFF800000 : f32
    %100 = vector.broadcast %cst_51 : f32 to vector<8x1xf32>
    %101 = arith.mulf %99, %100 : vector<8x1xf32>
    %cst_52 = arith.constant 1.000000e+00 : f32
    %102 = vector.broadcast %cst_52 : f32 to vector<8x1xf32>
    %103 = arith.cmpf oeq, %97, %102 : vector<8x1xf32>
    %cst_53 = arith.constant 0xFF800000 : f32
    %104 = vector.shape_cast %103 : vector<8x1xi1> to vector<8x1xi1>
    %105 = vector.broadcast %104 : vector<8x1xi1> to vector<8x13xi1>
    %106 = vector.broadcast %cst_53 : f32 to vector<8x13xf32>
    %107 = arith.select %105, %106, %96 : vector<8x13xi1>, vector<8x13xf32>
    %cst_54 = arith.constant 0xFF800000 : f32
    %108 = vector.broadcast %cst_54 : f32 to vector<8x2xf32>
    %109 = tpu.concatenate %101, %107, %108 in 1 : vector<8x1xf32>, vector<8x13xf32>, vector<8x2xf32> -> vector<8x16xf32>
    %c0_55 = arith.constant 0 : index
    %c0_56 = arith.constant 0 : index
    %110 = vector.load %arg16[%c0_55, %c0_56] : memref<8x16xf32, #tpu.memory_space<vmem>>, vector<8x16xf32>
    tpu.vector_store %arg16[%c0_55, %c0_56], %109 {strides = array<i32>} : memref<8x16xf32, #tpu.memory_space<vmem>>, vector<8x16xf32>,
    return
  }
  func.func @transform_0(%arg0: i32) -> (i32, i32) {
    %c0_i32 = arith.constant 0 : i32
    %c0_i32_0 = arith.constant 0 : i32
    return %arg0, %c0_i32 : i32, i32
  }
  func.func @transform_1(%arg0: i32) -> (i32, i32, i32) {
    %c0_i32 = arith.constant 0 : i32
    %c0_i32_0 = arith.constant 0 : i32
    %c0_i32_1 = arith.constant 0 : i32
    return %arg0, %c0_i32, %c0_i32_0 : i32, i32, i32
  }
  func.func @transform_2(%arg0: i32) -> (i32, i32) {
    %c0_i32 = arith.constant 0 : i32
    %c0_i32_0 = arith.constant 0 : i32
    return %arg0, %c0_i32 : i32, i32
  }
  func.func @transform_3(%arg0: i32) -> (i32, i32, i32) {
    %c0_i32 = arith.constant 0 : i32
    %c0_i32_0 = arith.constant 0 : i32
    %c0_i32_1 = arith.constant 0 : i32
    return %arg0, %c0_i32, %c0_i32_0 : i32, i32, i32
  }
  func.func @transform_4(%arg0: i32) -> (i32, i32) {
    %c0_i32 = arith.constant 0 : i32
    %c0_i32_0 = arith.constant 0 : i32
    return %arg0, %c0_i32 : i32, i32
  }
  func.func @transform_5(%arg0: i32) -> (i32, i32) {
    %c0_i32 = arith.constant 0 : i32
    %c0_i32_0 = arith.constant 0 : i32
    return %arg0, %c0_i32 : i32, i32
  }
  func.func @transform_6(%arg0: i32) -> (i32, i32) {
    %c0_i32 = arith.constant 0 : i32
    %c0_i32_0 = arith.constant 0 : i32
    %c0_i32_1 = arith.constant 0 : i32
    return %c0_i32, %c0_i32_0 : i32, i32
  }
  func.func @transform_7(%arg0: i32) -> (i32, i32) {
    %c0_i32 = arith.constant 0 : i32
    %c0_i32_0 = arith.constant 0 : i32
    %c0_i32_1 = arith.constant 0 : i32
    return %c0_i32, %c0_i32_0 : i32, i32
  }
  func.func @transform_8(%arg0: i32) -> (i32, i32) {
    %c0_i32 = arith.constant 0 : i32
    %c0_i32_0 = arith.constant 0 : i32
    %c0_i32_1 = arith.constant 0 : i32
    return %c0_i32, %c0_i32_0 : i32, i32
  }
  func.func @transform_9(%arg0: i32) -> (i32, i32) {
    %c0_i32 = arith.constant 0 : i32
    %c0_i32_0 = arith.constant 0 : i32
    %c0_i32_1 = arith.constant 0 : i32
    return %c0_i32, %c0_i32_0 : i32, i32
  }
  func.func @transform_10(%arg0: i32) -> (i32, i32) {
    %c0_i32 = arith.constant 0 : i32
    %c0_i32_0 = arith.constant 0 : i32
    %c0_i32_1 = arith.constant 0 : i32
    return %c0_i32, %c0_i32_0 : i32, i32
  }
  func.func @transform_11(%arg0: i32) -> (i32, i32) {
    %c0_i32 = arith.constant 0 : i32
    %c0_i32_0 = arith.constant 0 : i32
    %c0_i32_1 = arith.constant 0 : i32
    return %c0_i32, %c0_i32_0 : i32, i32
  }
  func.func @transform_12(%arg0: i32) -> (i32, i32) {
    %c0_i32 = arith.constant 0 : i32
    %c0_i32_0 = arith.constant 0 : i32
    %c0_i32_1 = arith.constant 0 : i32
    return %c0_i32, %c0_i32_0 : i32, i32
  }
  func.func @transform_13(%arg0: i32) -> (i32, i32) {
    %c0_i32 = arith.constant 0 : i32
    %c0_i32_0 = arith.constant 0 : i32
    %c0_i32_1 = arith.constant 0 : i32
    return %c0_i32, %c0_i32_0 : i32, i32
  }
  func.func @transform_14(%arg0: i32) -> (i32, i32) {
    %c0_i32 = arith.constant 0 : i32
    %c0_i32_0 = arith.constant 0 : i32
    %c0_i32_1 = arith.constant 0 : i32
    return %c0_i32, %c0_i32_0 : i32, i32
  }
  func.func @transform_15(%arg0: i32) -> (i32, i32) {
    %c0_i32 = arith.constant 0 : i32
    %c0_i32_0 = arith.constant 0 : i32
    return %arg0, %c0_i32 : i32, i32
  }
  func.func @transform_16(%arg0: i32) -> (i32, i32) {
    %c0_i32 = arith.constant 0 : i32
    %c0_i32_0 = arith.constant 0 : i32
    return %arg0, %c0_i32 : i32, i32
  }
}

</mosaic_0001>

<bundles_post_ra>
// kernel: tpu_custom_call.1
= control target key start
LH: loop header
LB: loop body
LE: loop exit
PB: predicated region body
PF: predicated region fallthrough
CT: control target
= control target key end

     0   :  { %s2643_s0 = inlined_call_operand.hbm [shape: bf16[8,32], index: 0, kind: input, shape index: {}]   ;;  %s2644_s1 = inlined_call_operand.hbm [shape: bf16[8,8,32], index: 1, kind: input, shape index: {}]   ;;  %s2645_s2 = inlined_call_operand.hbm [shape: s32[8,8], index: 2, kind: input, shape index: {}]   ;;  %s2646_s3 = inlined_call_operand.hbm [shape: bf16[8,8,32], index: 3, kind: input, shape index: {}]   ;;  %s2647_s4 = inlined_call_operand.hbm [shape: s32[8,8], index: 4, kind: input, shape index: {}]   ;;  %s2648_s5 = inlined_call_operand.vmem [shape: f32[8,1], index: 5, kind: input, shape index: {}]   ;;  %s2649_s6 = inlined_call_operand.vmem [shape: bf16[32,69], index: 6, kind: input, shape index: {}]   ;;  %s2650_s7 = inlined_call_operand.vmem [shape: bf16[32,32], index: 7, kind: input, shape index: {}]   ;;  %s2651_s8 = inlined_call_operand.vmem [shape: f32[1,32], index: 8, kind: input, shape index: {}]   ;;  %s2652_s9 = inlined_call_operand.vmem [shape: f32[1,32], index: 9, kind: input, shape index: {}]   ;;  %s2653_s10 = inlined_call_operand.hbm [shape: bf16[32,37], index: 10, kind: input, shape index: {}]   ;;  %s2654_s11 = inlined_call_operand.vmem [shape: bf16[32,32], index: 11, kind: input, shape index: {}]   ;;  %s2655_s12 = inlined_call_operand.vmem [shape: f32[1,32], index: 12, kind: input, shape index: {}]   ;;  %s2656_s13 = inlined_call_operand.vmem [shape: f32[1,32], index: 13, kind: input, shape index: {}]   ;;  %s2657_s14 = inlined_call_operand.vmem [shape: f32[1,5], index: 14, kind: input, shape index: {}]   ;;  %s2658_s15 = inlined_call_operand.hbm [shape: f32[8,16], index: 15, kind: output, shape index: {0}]   ;;  %s2659_s16 = inlined_call_operand.hbm [shape: f32[8,32], index: 16, kind: output, shape index: {1}]  }
   0x1   :  { %2662 = sst [smem:[#allocation22_spill]] %s2643_s0 }
   0x2   :  { %2663 = sst [smem:[#allocation23_spill]] %s2658_s15 }
   0x3   :  { %22 = vsyncpa [#allocation3], 0 }
   0x4   :  { %23 = vsyncpa [#allocation6], 0 }
   0x5   :  { %24 = vsyncpa [#allocation9], 0 }
   0x6   :  { %25 = vsyncpa [#allocation12], 0 }
   0x7   :  { %26 = vsyncpa [#allocation4], 0 }
   0x8   :  { %27 = vsyncpa [#allocation15], 0  ;;  %s2212_s21 = smov [#allocation5]   ;;  %s2024_s25 = scalar_lea.hbm %s2644_s1, 512 }
   0x9   :  { %s43_s22 = sshll.u32 %s2212_s21, 4  ;;  %p2025_p0 = scmp.ne.s32.totalorder %s2644_s1, %s2024_s25  ;;  %s44_s22 = int_to_ptr.vmem [resolvable:$true] %s43_s22 }
   0xa   :  { %p2028_p1 = scmp.lt.u32.totalorder %s2024_s25, %s2644_s1 }
   0xc   :  { %p2030_p2 = pnand %p2028_p1, %p2025_p0 }
   0xe   :  { %2033 = shalt.err (!%p2030_p2)
}
   0xf   :  { %s2034_s30 = scalar_lea.vmem %s44_s22, 512  ;;  %p2039_p4 = scmp.lt.s32.totalorder %s44_s22, %s44_s22 }
  0x10   :  { %p2035_p3 = scmp.ne.s32.totalorder %s44_s22, %s2034_s30  ;;  %p2040_p5 = scmp.lt.s32.totalorder %s2034_s30, %s2034_s30 }
  0x12   :  { %p2041_p6 = por %p2040_p5, %p2039_p4 }
  0x14   :  { %p2042_p7 = pnand %p2041_p6, %p2035_p3 }
  0x16   :  { %2045 = shalt.err (!%p2042_p7)
}
  0x17   :  { %s2213_s0 = smov 64   ;;  %s2214_s17 = smov 4  }
  0x18   :  { %49 = dma.hbm_to_vmem [thread:$0]  %s2644_s1, 512, %s44_s22, [#allocation6], %s2213_s0, %s2213_s0, %s2214_s17  }
  0x19   :  { %s2215_s20 = smov [#allocation8]   ;;  %s2216_s23 = smov [#allocation2]  }
  0x1a   :  { %s65_s21 = sshll.u32 %s2215_s20, 4  ;;  %s34_s24 = sshll.u32 %s2216_s23, 4  ;;  %s66_s21 = int_to_ptr.vmem [resolvable:$true] %s65_s21  ;;  %s35_s24 = int_to_ptr.vmem [resolvable:$true] %s34_s24 }
  0x1b   :  { %s2046_s27 = scalar_lea.hbm %s2646_s3, 512 }
  0x1c   :  { %p2047_p8 = scmp.ne.s32.totalorder %s2646_s3, %s2046_s27  ;;  %p2050_p9 = scmp.lt.u32.totalorder %s2046_s27, %s2646_s3 }
  0x1e   :  { %p2052_p10 = pnand %p2050_p9, %p2047_p8 }
  0x20   :  { %2055 = shalt.err (!%p2052_p10)
}
  0x21   :  { %s2056_s1 = scalar_lea.vmem %s66_s21, 512  ;;  %p2061_p12 = scmp.lt.s32.totalorder %s66_s21, %s66_s21 }
  0x22   :  { %p2057_p11 = scmp.ne.s32.totalorder %s66_s21, %s2056_s1  ;;  %p2062_p13 = scmp.lt.s32.totalorder %s2056_s1, %s2056_s1 }
  0x24   :  { %p2063_p0 = por %p2062_p13, %p2061_p12 }
  0x26   :  { %p2064_p1 = pnand %p2063_p0, %p2057_p11 }
  0x28   :  { %2067 = shalt.err (!%p2064_p1)
}
  0x29   :  { %71 = dma.hbm_to_vmem [thread:$0]  %s2646_s3, 512, %s66_s21, [#allocation9], %s2213_s0, %s2213_s0, %s2214_s17  }
  0x2a   :  { %s2664_s20 = sld [smem:[#allocation22_spill]] }
  0x30   :  { %s2068_s23 = scalar_lea.hbm %s2664_s20, 64 }
  0x31   :  { %p2069_p2 = scmp.ne.s32.totalorder %s2664_s20, %s2068_s23  ;;  %p2072_p3 = scmp.lt.u32.totalorder %s2068_s23, %s2664_s20 }
  0x33   :  { %p2074_p4 = pnand %p2072_p3, %p2069_p2 }
  0x35   :  { %2077 = shalt.err (!%p2074_p4)
}
  0x36   :  { %s2078_s29 = scalar_lea.vmem %s35_s24, 64  ;;  %p2083_p6 = scmp.lt.s32.totalorder %s35_s24, %s35_s24 }
  0x37   :  { %p2079_p5 = scmp.ne.s32.totalorder %s35_s24, %s2078_s29  ;;  %p2084_p7 = scmp.lt.s32.totalorder %s2078_s29, %s2078_s29 }
  0x39   :  { %p2085_p8 = por %p2084_p7, %p2083_p6 }
  0x3b   :  { %p2086_p9 = pnand %p2085_p8, %p2079_p5 }
  0x3d   :  { %2089 = shalt.err (!%p2086_p9)
}
  0x3e   :  { %37 = dma.hbm_to_vmem [thread:$0]  %s2664_s20, 64, %s35_s24, [#allocation3]  }
  0x3f   :  { %s2217_s30 = smov [#allocation7]   ;;  %s2218_s22 = smov [#allocation10]  }
  0x40   :  { %s56_s1 = sshll.u32 %s2217_s30, 4  ;;  %s78_s18 = sshll.u32 %s2218_s22, 4  ;;  %s57_s1 = int_to_ptr.vmem [resolvable:$true] %s56_s1  ;;  %s79_s18 = int_to_ptr.vmem [resolvable:$true] %s78_s18 }
  0x41   :  { %s2090_s23 = scalar_lea.hbm %s2645_s2, 128 }
  0x42   :  { %p2091_p10 = scmp.ne.s32.totalorder %s2645_s2, %s2090_s23  ;;  %p2094_p11 = scmp.lt.u32.totalorder %s2090_s23, %s2645_s2 }
  0x44   :  { %p2096_p12 = pnand %p2094_p11, %p2091_p10 }
  0x46   :  { %2099 = shalt.err (!%p2096_p12)
}
  0x47   :  { %s2100_s24 = scalar_lea.vmem %s57_s1, 128  ;;  %p2105_p0 = scmp.lt.s32.totalorder %s57_s1, %s57_s1 }
  0x48   :  { %p2101_p13 = scmp.ne.s32.totalorder %s57_s1, %s2100_s24  ;;  %p2106_p1 = scmp.lt.s32.totalorder %s2100_s24, %s2100_s24 }
  0x4a   :  { %p2107_p2 = por %p2106_p1, %p2105_p0 }
  0x4c   :  { %p2108_p3 = pnand %p2107_p2, %p2101_p13 }
  0x4e   :  { %2111 = shalt.err (!%p2108_p3)
}
  0x4f   :  { %59 = dma.hbm_to_vmem [thread:$0]  %s2645_s2, 128, %s57_s1, [#allocation6]  }
  0x50   :  { %s2112_s30 = scalar_lea.hbm %s2647_s4, 128 }
  0x51   :  { %p2113_p4 = scmp.ne.s32.totalorder %s2647_s4, %s2112_s30  ;;  %p2116_p5 = scmp.lt.u32.totalorder %s2112_s30, %s2647_s4 }
  0x53   :  { %p2118_p6 = pnand %p2116_p5, %p2113_p4 }
  0x55   :  { %2121 = shalt.err (!%p2118_p6)
}
  0x56   :  { %s2122_s25 = scalar_lea.vmem %s79_s18, 128  ;;  %p2127_p8 = scmp.lt.s32.totalorder %s79_s18, %s79_s18 }
  0x57   :  { %p2123_p7 = scmp.ne.s32.totalorder %s79_s18, %s2122_s25  ;;  %p2128_p9 = scmp.lt.s32.totalorder %s2122_s25, %s2122_s25 }
  0x59   :  { %p2129_p10 = por %p2128_p9, %p2127_p8 }
  0x5b   :  { %p2130_p11 = pnand %p2129_p10, %p2123_p7 }
  0x5d   :  { %2133 = shalt.err (!%p2130_p11)
}
  0x5e   :  { %81 = dma.hbm_to_vmem [thread:$0]  %s2647_s4, 128, %s79_s18, [#allocation9]  }
  0x5f   :  { %s2219_s26 = smov [#allocation11]   ;;  %s2134_s20 = scalar_lea.hbm %s2653_s10, 256 }
  0x60   :  { %s97_s27 = sshll.u32 %s2219_s26, 4  ;;  %p2135_p12 = scmp.ne.s32.totalorder %s2653_s10, %s2134_s20  ;;  %s98_s27 = int_to_ptr.vmem [resolvable:$true] %s97_s27 }
  0x61   :  { %p2138_p13 = scmp.lt.u32.totalorder %s2134_s20, %s2653_s10 }
  0x63   :  { %p2140_p0 = pnand %p2138_p13, %p2135_p12 }
  0x65   :  { %2143 = shalt.err (!%p2140_p0)
}
  0x66   :  { %s2144_s22 = scalar_lea.vmem %s98_s27, 256  ;;  %p2149_p2 = scmp.lt.s32.totalorder %s98_s27, %s98_s27 }
  0x67   :  { %p2145_p1 = scmp.ne.s32.totalorder %s98_s27, %s2144_s22  ;;  %p2150_p3 = scmp.lt.s32.totalorder %s2144_s22, %s2144_s22 }
  0x69   :  { %p2151_p4 = por %p2150_p3, %p2149_p2 }
  0x6b   :  { %p2152_p5 = pnand %p2151_p4, %p2145_p1 }
  0x6d   :  { %2155 = shalt.err (!%p2152_p5)
}
  0x6e   :  { %103 = dma.hbm_to_vmem [thread:$0]  %s2653_s10, 256, %s98_s27, [#allocation12], %s2213_s0, %s2213_s0, %s2214_s17  }
  0x6f   :  { %2200 = dma.done.wait [#allocation3], 64  }
  0x70   :  { %2201 = vsyncadd [#allocation3], 4294967232 }
  0x71   :  { %2202 = dma.done.wait [#allocation6], 640  }
  0x72   :  { %2203 = vsyncadd [#allocation6], 4294966656 }
  0x73   :  { %2204 = dma.done.wait [#allocation9], 640  }
  0x74   :  { %2205 = vsyncadd [#allocation9], 4294966656 }
  0x75   :  { %2206 = dma.done.wait [#allocation12], 256  }
  0x76   :  { %2207 = vsyncadd [#allocation12], 4294967040  ;;  %v2220_v0 = vmov 0.0   ;;  %vm2221_vm0 = vmmov 0   ;;  %v1996_v1 = vld [vmem:[%s2649_s6] sm:$0xff]   ;;  %v1998_v3 = vld [vmem:[%s2649_s6 + $0x8] sm:$0xff]   ;;  %v318_v11 = vlaneseq }
  0x77   :  { %1897 = vmatprep.subr.bf16.mxu0 %v2220_v0  ;;  %1901 = vmatprep.mubr.msk.bf16.mxu0 %vm2221_vm0, %v2220_v0  ;;  %v1997_v2 = vld [vmem:[%s2650_s7] sm:$0xff]   ;;  %v1999_v4 = vld [vmem:[%s2650_s7 + $0x8] sm:$0xff]   ;;  %vm156_vm1 = vcmask 261120   ;;  %v2416_v8 = vld [vmem:[#allocation5 + $0x10] sm:$0xff]   ;;  %v2222_v15 = vmov 1966171168  }
  0x78   :  { %1898 = vmatpush3.bf16.msra.mxu0 %v1996_v1  ;;  %1905 = vmatprep.subr.bf16.mxu1 %v1997_v2  ;;  %v2412_v5 = vld [vmem:[#allocation5] sm:$0xff]   ;;  %v2414_v6 = vld [vmem:[#allocation5 + $0x8] sm:$0xff]   ;;  %v131_v7 = vld [vmem:[#allocation2] sm:$0xf]  ;;  %v319_v12 = vshrl.u32 %v318_v11, 7  ;;  %v500_v13 = vand.u32 127, %v318_v11  ;;  %v316_v16 = vunpack.c.l.s4 %v2222_v15 }
  0x79   :  { %1899 = vmatprep.subr.bf16.mxu0 %v2220_v0  ;;  %1906 = vmatpush3.bf16.msra.mxu1 %v1997_v2  ;;  %v611_v9 = vunpack.c.l.bf16 %v2412_v5  ;;  %v2431_v10 = vld [vmem:[#allocation5 + $0x18] sm:$0xff]   ;;  %vm533_vm10 = vcmask 1041409   ;;  %vm535_vm11 = vcmask 1042434   ;;  %vm537_vm12 = vcmask 1043459   ;;  %s2227_s4 = smov [#allocation14]  }
  0x7a   :  { %1907 = vmatprep.subr.bf16.mxu1 %v1999_v4  ;;  %1909 = vmatprep.mubr.msk.bf16.mxu1 %vm156_vm1, %v2412_v5  ;;  %v2437_v14 = vsub.s32 %v500_v13, %v319_v12  ;;  %v317_v17 = vunpack.c.0.s8 %v316_v16  ;;  %v2447_v23 = vsub.s32 0, %v319_v12  ;;  %v1837_v37 = vld [vmem:[%s2651_s8] ss:$0 sm:$0xff]  ;;  %vm539_vm13 = vcmask 1044484   ;;  %s1808_s18 = sshll.u32 %s2227_s4, 4  ;;  %s1809_s18 = int_to_ptr.vmem [resolvable:$true] %s1808_s18 }
  0x7b   :  { %v1838_v63 = vld [vmem:[%s2652_s9] ss:$0 sm:$0xff]  ;;  %vm541_vm14 = vcmask 1045509   ;;  %vm543_vm15 = vcmask 1046534   ;;  %s2156_s19 = scalar_lea.vmem %s1809_s18, 128  ;;  %p2161_p7 = scmp.lt.s32.totalorder %s1809_s18, %s1809_s18 }
  0x7c   :  { %1900 = vmatpush3.bf16.msra.mxu0 %v1998_v3  ;;  %v2439_v18 = vsub.s32 %v317_v17, %v319_v12  ;;  %p2157_p6 = scmp.ne.s32.totalorder %s1809_s18, %s2156_s19  ;;  %p2162_p8 = scmp.lt.s32.totalorder %s2156_s19, %s2156_s19 }
  0x7d   :  { %1917 = vmatprep.subr.mxu0 %v2220_v0  ;;  %1908 = vmatpush3.bf16.msra.mxu1 %v1999_v4 }
  0x7e   :  { %1942 = vmatprep.subr.mxu1 %v2220_v0  ;;  %p2163_p9 = por %p2162_p8, %p2161_p7 }
  0x7f   :  { %1902 = vmatmul.mubr.msk.bf16.vlgmr.msra.gmra.mrb[0].mxu0 %vm156_vm1, %v131_v7 }
  0x80   :  { %1918 = vmatpush3.msra.mxu0 %v611_v9  ;;  %1919 = vmatprep.mubr.msk.f32.mxu0 %vm2221_vm0, %v2220_v0  ;;  %p2164_p10 = pnand %p2163_p9, %p2157_p6 }
  0x81   :  { %1910 = vmatmul.mubr.msk.bf16.vlgmr.msra.gmra.mrb[0].mxu1 %vm156_vm1, %v2414_v6  ;;  %1922 = vmatprep.subr.mxu0 %v2220_v0 }
  0x82   :  { %1913 = vmatprep.mubr.msk.bf16.mxu1 %vm156_vm1, %v2416_v8 }
  0x89   :  { %1914 = vmatmul.mubr.msk.bf16.gmra.mrb[4].mxu1 %vm156_vm1, %v2431_v10 }
  0x8a   :  { %1944 = vmatprep.mubr.msk.f32.mxu1 %vm2221_vm0, %v2220_v0 }
 0x152   :  { %v2441_v19 = vpop.f32.mrb[0].mxu0 }
 0x153   :  { %v314_v20 = vcombine.high %v2441_v19, %v2441_v19  ;;  %v321_v21 = vrot.slane %v2441_v19, %v2439_v18  ;;  %v1903_v22 = vpop.f32.mrb[1].mxu0 }
 0x154   :  { %v197_v24 = vpop.f32.mrb[2].mxu0  ;;  %v1911_v25 = vpop.f32.mrb[0].mxu1 }
 0x155   :  { %v328_v26 = vrot.slane %v314_v20, %v2439_v18  ;;  %v329_v27 = vcombine.high %v321_v21, %v321_v21  ;;  %v337_v28 = vrot.slane %v321_v21, %v2439_v18  ;;  %v1904_v29 = vpop.f32.mrb[3].mxu0  ;;  %v282_v30 = vpop.f32.mrb[1].mxu1 }
 0x156   :  { %v1912_v31 = vpop.f32.mrb[2].mxu1 }
 0x157   :  { %v330_v32 = vcombine.high %v328_v26, %v328_v26  ;;  %v359_v33 = vcombine.high %v337_v28, %v337_v28  ;;  %v366_v34 = vrot.slane %v337_v28, %v2447_v23  ;;  %v351_v35 = vrot.slane %v329_v27, %v2439_v18  ;;  %v285_v36 = vpop.f32.mrb[3].mxu1 }
 0x158   :  { %v344_v38 = vrot.slane %v328_v26, %v2439_v18 }
 0x159   :  { %v374_v39 = vrot.slane %v359_v33, %v2447_v23  ;;  %v403_v40 = vadd.f32 %v366_v34, %v282_v30  ;;  %v361_v41 = vcombine.high %v351_v35, %v351_v35  ;;  %v370_v42 = vrot.slane %v351_v35, %v2447_v23 }
 0x15a   :  { %v360_v43 = vcombine.high %v344_v38, %v344_v38  ;;  %v358_v44 = vrot.slane %v330_v32, %v2439_v18  ;;  %v382_v51 = vrot.slane %v344_v38, %v2447_v23 }
 0x15b   :  { %v405_v45 = vadd.f32 %v1911_v25, %v374_v39  ;;  %v418_v46 = vadd.f32 %v1837_v37, %v403_v40  ;;  %v378_v47 = vrot.slane %v361_v41, %v2447_v23  ;;  %v404_v48 = vadd.f32 %v370_v42, %v285_v36 }
 0x15c   :  { %v1915_v49 = vpop.f32.mrb[4].mxu1  ;;  %v390_v50 = vrot.slane %v360_v43, %v2447_v23  ;;  %v362_v52 = vcombine.high %v358_v44, %v358_v44  ;;  %v386_v53 = vrot.slane %v358_v44, %v2447_v23 }
 0x15d   :  { %v420_v54 = vadd.f32 %v1837_v37, %v405_v45  ;;  %v434_v55 = vmul.f32 0.01, %v418_v46  ;;  %v406_v56 = vadd.f32 %v1912_v31, %v378_v47  ;;  %v419_v57 = vadd.f32 %v1837_v37, %v404_v48  ;;  %v298_v58 = vpop.f32.mrb[5].mxu1 }
 0x15e   :  { %v409_v59 = vadd.f32 %v1915_v49, %v390_v50  ;;  %v407_v60 = vadd.f32 %v382_v51, %v298_v58  ;;  %v1916_v61 = vpop.f32.mrb[6].mxu1  ;;  %v394_v62 = vrot.slane %v362_v52, %v2447_v23  ;;  %vm426_vm2 = vcmp.gt.f32.partialorder %v418_v46, 0.0 }
 0x15f   :  { %v436_v1 = vmul.f32 0.01, %v420_v54  ;;  %v421_v2 = vadd.f32 %v1837_v37, %v406_v56  ;;  %v435_v3 = vmul.f32 0.01, %v419_v57  ;;  %v301_v4 = vpop.f32.mrb[7].mxu1  ;;  %v442_v7 = vsel %vm426_vm2, %v418_v46, %v434_v55 }
 0x160   :  { %v424_v9 = vadd.f32 %v1837_v37, %v409_v59  ;;  %v422_v11 = vadd.f32 %v1837_v37, %v407_v60  ;;  %v410_v12 = vadd.f32 %v1916_v61, %v394_v62  ;;  %v408_v13 = vadd.f32 %v386_v53, %v301_v4 }
 0x161   :  { %v437_v15 = vmul.f32 0.01, %v421_v2  ;;  %v457_v16 = vmul.f32 %v1838_v63, %v442_v7  ;;  %vm428_vm3 = vcmp.gt.f32.partialorder %v420_v54, 0.0  ;;  %vm427_vm4 = vcmp.gt.f32.partialorder %v419_v57, 0.0 }
 0x162   :  { %v438_v17 = vmul.f32 0.01, %v422_v11  ;;  %v425_v20 = vadd.f32 %v1837_v37, %v410_v12  ;;  %v423_v21 = vadd.f32 %v1837_v37, %v408_v13  ;;  %v444_v24 = vsel %vm428_vm3, %v420_v54, %v436_v1 }
 0x163   :  { %v465_v22 = vsel %vm156_vm1, %v457_v16, 0.0  ;;  %v443_v25 = vsel %vm427_vm4, %v419_v57, %v435_v3  ;;  %vm429_vm5 = vcmp.gt.f32.partialorder %v421_v2, 0.0  ;;  %v440_v26 = vmul.f32 0.01, %v424_v9  ;;  %v489_v3 = vld [vmem:[#allocation7] sm:$0xff] }
 0x164   :  { %v439_v27 = vmul.f32 0.01, %v423_v21  ;;  %466 = vadd.xlane.f32.xlu0 %v465_v22  ;;  %v459_v28 = vmul.f32 %v1838_v63, %v444_v24  ;;  %v458_v29 = vmul.f32 %v1838_v63, %v443_v25  ;;  %v445_v30 = vsel %vm429_vm5, %v421_v2, %v437_v15 }
 0x165   :  { %vm430_vm6 = vcmp.gt.f32.partialorder %v422_v11, 0.0  ;;  %vm431_vm7 = vcmp.gt.f32.partialorder %v423_v21, 0.0  ;;  %vm432_vm8 = vcmp.gt.f32.partialorder %v424_v9, 0.0  ;;  %v460_v32 = vmul.f32 %v1838_v63, %v445_v30 }
 0x166   :  { %v471_v31 = vsel %vm156_vm1, %v459_v28, 0.0  ;;  %v446_v33 = vsel %vm430_vm6, %v422_v11, %v438_v17  ;;  %v441_v34 = vmul.f32 0.01, %v425_v20  ;;  %v468_v35 = vsel %vm156_vm1, %v458_v29, 0.0 }
 0x167   :  { %472 = vadd.xlane.f32.xlu1 %v471_v31  ;;  %v461_v36 = vmul.f32 %v1838_v63, %v446_v33  ;;  %v447_v37 = vsel %vm431_vm7, %v423_v21, %v439_v27  ;;  %v448_v38 = vsel %vm432_vm8, %v424_v9, %v440_v26  ;;  %vm433_vm9 = vcmp.gt.f32.partialorder %v425_v20, 0.0 }
 0x168   :  { %469 = vadd.xlane.f32.xlu0 %v468_v35  ;;  %v474_v39 = vsel %vm156_vm1, %v460_v32, 0.0  ;;  %v462_v40 = vmul.f32 %v1838_v63, %v447_v37  ;;  %v463_v42 = vmul.f32 %v1838_v63, %v448_v38  ;;  %v449_v43 = vsel %vm433_vm9, %v425_v20, %v441_v34 }
 0x169   :  { %v477_v41 = vsel %vm156_vm1, %v461_v36, 0.0  ;;  %v464_v45 = vmul.f32 %v1838_v63, %v449_v43  ;;  %vm545_vm2 = vcmask 1047559   ;;  %vm490_vm3 = vcmp.eq.s32.totalorder %v489_v3, 0 }
 0x16a   :  { %v480_v44 = vsel %vm156_vm1, %v462_v40, 0.0  ;;  %v483_v46 = vsel %vm156_vm1, %v463_v42, 0.0  ;;  %vm549_vm4 = vcmask 64512   ;;  %v616_v24 = vunpack.c.h.bf16 %v2416_v8 }
 0x16b   :  { %475 = vadd.xlane.f32.xlu1 %v474_v39  ;;  %v486_v47 = vsel %vm156_vm1, %v464_v45, 0.0  ;;  %v612_v30 = vunpack.c.h.bf16 %v2412_v5  ;;  %v613_v35 = vunpack.c.l.bf16 %v2414_v6  ;;  %v618_v37 = vunpack.c.h.bf16 %v2431_v10  ;;  %v2006_v45 = vld [vmem:[#allocation8] sm:$0xff]  }
 0x16c   :  { %478 = vadd.xlane.f32.xlu0 %v477_v41  ;;  %1943 = vmatpush3.msra.mxu1 %v616_v24  ;;  %v614_v38 = vunpack.c.h.bf16 %v2414_v6  ;;  %v615_v41 = vunpack.c.l.bf16 %v2416_v8  ;;  %v617_v42 = vunpack.c.l.bf16 %v2431_v10  ;;  %v2004_v10 = vld [vmem:[%s2654_s11] sm:$0xff]  }
 0x16d   :  { %1952 = vmatprep.subr.mxu1 %v2220_v0 }
 0x16f   :  { %481 = vadd.xlane.f32.xlu1 %v480_v44  ;;  %v2005_v44 = vld [vmem:[%s2654_s11 + $0x8] sm:$0xff]   ;;  %s2223_s11 = smov 32  }
 0x170   :  { %484 = vadd.xlane.f32.xlu0 %v483_v46  ;;  %v2007_v46 = vld [vmem:[#allocation8 + $0x8] sm:$0xff]  }
 0x173   :  { %487 = vadd.xlane.f32.xlu1 %v486_v47  ;;  %v2008_v47 = vld [vmem:[#allocation11] sm:$0xff]  }
 0x1f1   :  { %v467_v48 = vpop.xlane.xlu0 %466 }
 0x1f2   :  { %v504_v51 = vrot.slane %v467_v48, %v2437_v14  ;;  %v2009_v48 = vld [vmem:[#allocation11 + $0x8] sm:$0xff]  }
 0x1f4   :  { %v473_v49 = vpop.xlane.xlu1 %472 }
 0x1f5   :  { %v470_v50 = vpop.xlane.xlu0 %469  ;;  %v512_v53 = vrot.slane %v473_v49, %v2437_v14  ;;  %v2010_v49 = vld [vmem:[#allocation8 + $0x10] sm:$0xff]  }
 0x1f6   :  { %v508_v52 = vrot.slane %v470_v50, %v2437_v14  ;;  %v2011_v50 = vld [vmem:[#allocation8 + $0x18] sm:$0xff]  }
 0x1f8   :  { %v534_v54 = vsel %vm533_vm10, %v508_v52, %v504_v51  ;;  %v476_v55 = vpop.xlane.xlu1 %475 }
 0x1f9   :  { %v536_v56 = vsel %vm535_vm11, %v512_v53, %v534_v54  ;;  %v516_v57 = vrot.slane %v476_v55, %v2437_v14  ;;  %v479_v58 = vpop.xlane.xlu0 %478 }
 0x1fa   :  { %v520_v59 = vrot.slane %v479_v58, %v2437_v14 }
 0x1fb   :  { %v538_v60 = vsel %vm537_vm12, %v516_v57, %v536_v56 }
 0x1fc   :  { %v540_v61 = vsel %vm539_vm13, %v520_v59, %v538_v60  ;;  %v482_v62 = vpop.xlane.xlu1 %481 }
 0x1fd   :  { %v524_v63 = vrot.slane %v482_v62, %v2437_v14  ;;  %v485_v1 = vpop.xlane.xlu0 %484 }
 0x1fe   :  { %v528_v2 = vrot.slane %v485_v1, %v2437_v14 }
 0x1ff   :  { %v542_v4 = vsel %vm541_vm14, %v524_v63, %v540_v61 }
 0x200   :  { %v488_v7 = vpop.xlane.xlu1 %487  ;;  %v544_v9 = vsel %vm543_vm15, %v528_v2, %v542_v4 }
 0x201   :  { %v532_v11 = vrot.slane %v488_v7, %v2437_v14 }
 0x203   :  { %v546_v12 = vsel %vm545_vm2, %v532_v11, %v544_v9 }
 0x204   :  { %v548_v13 = vsel %vm490_vm3, -inf, %v546_v12 }
 0x205   :  { %v550_v15 = vsel %vm549_vm4, %v548_v13, -inf }
 0x206   :  { %551 = vmax.xlane.f32.xlu0 %v550_v15 }
 0x293   :  { %v552_v16 = vpop.xlane.xlu0 %551 }
 0x294   :  { %v553_v17 = vsub.f32 %v548_v13, %v552_v16 }
 0x296   :  { %v554_v20 = vmul.f32 1.442695, %v553_v17 }
 0x298   :  { %2016 = vpow2.f32 %v554_v20 }
 0x2a2   :  { %v2017_v21 = vpop.eup %2016 }
 0x2a3   :  { %v556_v22 = vsel %vm549_vm4, %v2017_v21, 0.0 }
 0x2a4   :  { %557 = vadd.xlane.f32.xlu1 %v556_v22 }
 0x331   :  { %v558_v25 = vpop.xlane.xlu1 %557 }
 0x332   :  { %2018 = vrcp.f32 %v558_v25 }
 0x33c   :  { %v2019_v26 = vpop.eup %2018 }
 0x33d   :  { %v560_v27 = vmul.f32 %v2019_v26, %v2017_v21 }
 0x33f   :  { %v562_v28 = vcombine.high %v560_v27, %v560_v27  ;;  %v569_v29 = vrot.slane %v560_v27, %v2439_v18 }
 0x341   :  { %v576_v31 = vrot.slane %v562_v28, %v2439_v18  ;;  %v585_v32 = vrot.slane %v569_v29, %v2439_v18  ;;  %v577_v33 = vcombine.high %v569_v29, %v569_v29 }
 0x343   :  { %v578_v34 = vcombine.high %v576_v31, %v576_v31  ;;  %1920 = vmatmul.mubr.msk.f32.vlgmr.msra.gmra.mrb[4].mxu0 %vm549_vm4, %v585_v32  ;;  %v599_v36 = vrot.slane %v577_v33, %v2439_v18  ;;  %v607_v39 = vcombine.high %v585_v32, %v585_v32  ;;  %v592_v43 = vrot.slane %v576_v31, %v2439_v18 }
 0x344   :  { %1923 = vmatpush3.msra.mxu0 %v612_v30  ;;  %1924 = vmatprep.mubr.msk.f32.mxu0 %vm2221_vm0, %v2220_v0 }
 0x345   :  { %1927 = vmatprep.subr.mxu0 %v2220_v0  ;;  %v606_v5 = vrot.slane %v578_v34, %v2439_v18  ;;  %v609_v6 = vcombine.high %v599_v36, %v599_v36  ;;  %v608_v8 = vcombine.high %v592_v43, %v592_v43 }
 0x347   :  { %1925 = vmatmul.mubr.msk.f32.vlgmr.msra.gmra.mrb[6].mxu0 %vm549_vm4, %v599_v36  ;;  %1945 = vmatmul.mubr.msk.f32.vlgmr.msra.gmra.mrb[8].mxu1 %vm549_vm4, %v606_v5  ;;  %v610_v40 = vcombine.high %v606_v5, %v606_v5 }
 0x348   :  { %1928 = vmatpush3.msra.mxu0 %v613_v35  ;;  %1929 = vmatprep.mubr.msk.f32.mxu0 %vm2221_vm0, %v2220_v0 }
 0x349   :  { %1932 = vmatprep.subr.mxu0 %v2220_v0  ;;  %1953 = vmatpush3.msra.mxu1 %v618_v37 }
 0x34a   :  { %1954 = vmatprep.mubr.msk.f32.mxu1 %vm2221_vm0, %v2220_v0  ;;  %1965 = vmatprep.subr.bf16.mxu1 %v2004_v10 }
 0x34b   :  { %1930 = vmatmul.mubr.msk.f32.vlgmr.msra.gmra.mrb[8].mxu0 %vm549_vm4, %v607_v39  ;;  %1955 = vmatmul.mubr.msk.f32.vlgmr.msra.gmra.mrb[10].mxu1 %vm549_vm4, %v610_v40 }
 0x34c   :  { %1933 = vmatpush3.msra.mxu0 %v614_v38  ;;  %1934 = vmatprep.mubr.msk.f32.mxu0 %vm2221_vm0, %v2220_v0 }
 0x34d   :  { %1937 = vmatprep.subr.mxu0 %v2220_v0  ;;  %1966 = vmatpush3.bf16.msra.mxu1 %v2004_v10 }
 0x34e   :  { %1967 = vmatprep.subr.bf16.mxu1 %v2005_v44  ;;  %1969 = vmatprep.mubr.msk.bf16.mxu1 %vm156_vm1, %v2006_v45 }
 0x34f   :  { %1935 = vmatmul.mubr.msk.f32.vlgmr.msra.gmra.mrb[10].mxu0 %vm549_vm4, %v609_v6 }
 0x350   :  { %1938 = vmatpush3.msra.mxu0 %v615_v41  ;;  %1939 = vmatprep.mubr.msk.f32.mxu0 %vm2221_vm0, %v2220_v0 }
 0x351   :  { %1947 = vmatprep.subr.mxu0 %v2220_v0  ;;  %1968 = vmatpush3.bf16.msra.mxu1 %v2005_v44 }
 0x353   :  { %1940 = vmatmul.mubr.msk.f32.vlgmr.msra.gmra.mrb[12].mxu0 %vm549_vm4, %v592_v43 }
 0x354   :  { %1948 = vmatpush3.msra.mxu0 %v617_v42  ;;  %1949 = vmatprep.mubr.msk.f32.mxu0 %vm2221_vm0, %v2220_v0 }
 0x355   :  { %1957 = vmatprep.subr.bf16.mxu0 %v2220_v0  ;;  %1970 = vmatmul.mubr.msk.bf16.vlgmr.msra.gmra.mrb[12].mxu1 %vm156_vm1, %v2007_v46 }
 0x356   :  { %1973 = vmatprep.mubr.msk.bf16.mxu1 %vm156_vm1, %v2010_v49 }
 0x357   :  { %1950 = vmatmul.mubr.msk.f32.vlgmr.msra.gmra.mrb[14].mxu0 %vm549_vm4, %v608_v8 }
 0x358   :  { %1961 = vmatprep.mubr.msk.bf16.mxu0 %vm2221_vm0, %v2220_v0  ;;  %1958 = vmatpush3.bf16.msra.mxu0 %v2008_v47 }
 0x359   :  { %1959 = vmatprep.subr.bf16.mxu0 %v2220_v0 }
 0x35c   :  { %1960 = vmatpush3.bf16.msra.mxu0 %v2009_v48 }
 0x35d   :  { %1974 = vmatmul.mubr.msk.bf16.gmra.mrb[16].mxu1 %vm156_vm1, %v2011_v50 }
 0x416   :  { %v687_v51 = vpop.f32.mrb[4].mxu0 }
 0x417   :  { %v1921_v52 = vpop.f32.mrb[5].mxu0  ;;  %v1219_v55 = vpack.c.bf16 %v687_v51, %v687_v51 }
 0x419   :  { %v1239_v63 = vunpack.c.l.b16 %v1219_v55 }
 0x41a   :  { %v759_v53 = vpop.f32.mrb[6].mxu0  ;;  %v1047_v54 = vpop.f32.mrb[8].mxu1 }
 0x41b   :  { %v1203_v56 = vrot.slane %v759_v53, 7  ;;  %v1220_v57 = vpack.c.bf16 %v759_v53, %v759_v53  ;;  %v1926_v58 = vpop.f32.mrb[7].mxu0  ;;  %v1946_v59 = vpop.f32.mrb[9].mxu1  ;;  %v1224_v21 = vpack.c.bf16 %v1047_v54, %v1047_v54  ;;  %v1211_v31 = vrot.slane %v1047_v54, 3 }
 0x41d   :  { %v1204_v60 = vsel %vm533_vm10, %v1203_v56, %v687_v51  ;;  %v1240_v0 = vunpack.c.l.b16 %v1220_v57  ;;  %v1244_v32 = vunpack.c.l.b16 %v1224_v21  ;;  %v1861_v56 = vld [vmem:[%s2655_s12] ss:$0 sm:$0xff]  ;;  %s2224_s12 = smov 96  }
 0x41e   :  { %v831_v61 = vpop.f32.mrb[8].mxu0  ;;  %v1191_v62 = vpop.f32.mrb[10].mxu1 }
 0x41f   :  { %v1247_v1 = vrot.slane %v1240_v0, 7  ;;  %v1205_v2 = vrot.slane %v831_v61, 6  ;;  %v1221_v3 = vpack.c.bf16 %v831_v61, %v831_v61  ;;  %v1931_v4 = vpop.f32.mrb[9].mxu0  ;;  %v1956_v7 = vpop.f32.mrb[11].mxu1  ;;  %v1226_v33 = vpack.c.bf16 %v1191_v62, %v1191_v62 }
 0x420   :  { %v1255_v6 = vrot.slane %v1244_v32, 3  ;;  %v1215_v42 = vrot.slane %v1191_v62, 1 }
 0x421   :  { %v1248_v9 = vsel %vm533_vm10, %v1247_v1, %v1239_v63  ;;  %v1206_v11 = vsel %vm535_vm11, %v1205_v2, %v1204_v60  ;;  %v1241_v12 = vunpack.c.l.b16 %v1221_v3  ;;  %v1246_v43 = vunpack.c.l.b16 %v1226_v33  ;;  %v1862_v1 = vld [vmem:[%s2656_s13] ss:$0 sm:$0xff] }
 0x422   :  { %v903_v13 = vpop.f32.mrb[10].mxu0 }
 0x423   :  { %v1249_v15 = vrot.slane %v1241_v12, 6  ;;  %v1207_v16 = vrot.slane %v903_v13, 5  ;;  %v1222_v17 = vpack.c.bf16 %v903_v13, %v903_v13  ;;  %v1936_v20 = vpop.f32.mrb[11].mxu0  ;;  %v1259_v48 = vrot.slane %v1246_v43, 1 }
 0x425   :  { %v1250_v22 = vsel %vm535_vm11, %v1249_v15, %v1248_v9  ;;  %v1208_v24 = vsel %vm537_vm12, %v1207_v16, %v1206_v11  ;;  %v1242_v25 = vunpack.c.l.b16 %v1222_v17 }
 0x426   :  { %v975_v26 = vpop.f32.mrb[12].mxu0 }
 0x427   :  { %v1251_v27 = vrot.slane %v1242_v25, 5  ;;  %v1209_v28 = vrot.slane %v975_v26, 4  ;;  %v1223_v29 = vpack.c.bf16 %v975_v26, %v975_v26  ;;  %v1941_v30 = vpop.f32.mrb[13].mxu0 }
 0x428   :  { %v1971_v52 = vpop.f32.mrb[12].mxu1 }
 0x429   :  { %v1252_v34 = vsel %vm537_vm12, %v1251_v27, %v1250_v22  ;;  %v1210_v35 = vsel %vm539_vm13, %v1209_v28, %v1208_v24  ;;  %v1243_v36 = vunpack.c.l.b16 %v1223_v29  ;;  %v1422_v53 = vpop.f32.mrb[13].mxu1 }
 0x42a   :  { %v1119_v5 = vpop.f32.mrb[14].mxu0  ;;  %v1212_v37 = vsel %vm541_vm14, %v1211_v31, %v1210_v35  ;;  %1551 = vrot.lane.b32.xlu1 %v1422_v53, %s2223_s11  ;;  %v1972_v54 = vpop.f32.mrb[14].mxu1 }
 0x42b   :  { %v1253_v38 = vrot.slane %v1243_v36, 4  ;;  %v1213_v39 = vrot.slane %v1119_v5, 2  ;;  %v1225_v40 = vpack.c.bf16 %v1119_v5, %v1119_v5  ;;  %v1951_v41 = vpop.f32.mrb[15].mxu0  ;;  %v1425_v55 = vpop.f32.mrb[15].mxu1 }
 0x42d   :  { %v1254_v8 = vsel %vm539_vm13, %v1253_v38, %v1252_v34  ;;  %v1245_v10 = vunpack.c.l.b16 %v1225_v40  ;;  %v1214_v44 = vsel %vm543_vm15, %v1213_v39, %v1212_v37 }
 0x42e   :  { %v1256_v45 = vsel %vm541_vm14, %v1255_v6, %v1254_v8  ;;  %v1216_v46 = vsel %vm545_vm2, %v1215_v42, %v1214_v44  ;;  %1553 = vrot.lane.b32.xlu1 %v1425_v55, %s2223_s11 }
 0x42f   :  { %v1257_v47 = vrot.slane %v1245_v10, 2  ;;  %1218 = vst.msk [vmem:[#allocation14] sm:$0xff] %vm156_vm1, %v1216_v46 }
 0x430   :  { %v1975_v57 = vpop.f32.mrb[16].mxu1 }
 0x431   :  { %v1258_v49 = vsel %vm543_vm15, %v1257_v47, %v1256_v45  ;;  %v1438_v58 = vpop.f32.mrb[17].mxu1 }
 0x432   :  { %v1260_v50 = vsel %vm545_vm2, %v1259_v48, %v1258_v49  ;;  %1555 = vrot.lane.b32.xlu1 %v1971_v52, %s2223_s11  ;;  %v1976_v59 = vpop.f32.mrb[18].mxu1 }
 0x433   :  { %v1261_v51 = vpack.c.b16 %v1260_v50, %v1260_v50  ;;  %v1441_v60 = vpop.f32.mrb[19].mxu1 }
 0x435   :  { %1962 = vmatmul.mubr.msk.bf16.vlgmr.msra.gmra.mrb[16].mxu0 %vm156_vm1, %v1261_v51 }
 0x436   :  { %1589 = vrot.lane.b32.xlu1 %v1861_v56, %s2223_s11 }
 0x43a   :  { %1561 = vrot.lane.b32.xlu1 %v1441_v60, %s2223_s11 }
 0x43e   :  { %1565 = vrot.lane.b32.xlu1 %v1976_v59, %s2223_s11 }
 0x49c   :  { %v1552_v2 = vpop.permute.xlu1 %1551 }
 0x4a0   :  { %v1554_v3 = vpop.permute.xlu1 %1553 }
 0x4a4   :  { %v1556_v4 = vpop.permute.xlu1 %1555 }
 0x4a8   :  { %v1590_v13 = vpop.permute.xlu1 %1589 }
 0x4ac   :  { %v1562_v31 = vpop.permute.xlu1 %1561 }
 0x4b0   :  { %v1566_v48 = vpop.permute.xlu1 %1565 }
 0x508   :  { %v1311_v0 = vpop.f32.mrb[16].mxu0 }
 0x509   :  { %1318 = vrot.lane.b32.xlu0 %v1311_v0, %s2223_s11  ;;  %v1963_v61 = vpop.f32.mrb[17].mxu0 }
 0x50a   :  { %v1314_v62 = vpop.f32.mrb[18].mxu0 }
 0x50b   :  { %v1964_v63 = vpop.f32.mrb[19].mxu0 }
 0x50d   :  { %1557 = vrot.lane.b32.xlu0 %v1972_v54, %s2223_s11 }
 0x511   :  { %1559 = vrot.lane.b32.xlu0 %v1438_v58, %s2223_s11 }
 0x515   :  { %1563 = vrot.lane.b32.xlu0 %v1975_v57, %s2223_s11 }
 0x519   :  { %1630 = vrot.lane.b32.xlu0 %v1862_v1, %s2223_s11 }
 0x57b   :  { %v1319_v7 = vpop.permute.xlu0 %1318 }
 0x57c   :  { %v2568_v9 = vadd.f32 %v1319_v7, %v2441_v19 }
 0x57e   :  { %v1454_v11 = vcombine.high %v2568_v9, %v2568_v9  ;;  %v1461_v12 = vrot.slane %v2568_v9, %v2439_v18 }
 0x57f   :  { %v1558_v15 = vpop.permute.xlu0 %1557 }
 0x580   :  { %v1468_v16 = vrot.slane %v1454_v11, %v2439_v18  ;;  %v1469_v17 = vcombine.high %v1461_v12, %v1461_v12  ;;  %v1477_v20 = vrot.slane %v1461_v12, %v2439_v18 }
 0x582   :  { %v1499_v21 = vcombine.high %v1477_v20, %v1477_v20  ;;  %v1506_v22 = vrot.slane %v1477_v20, %v2447_v23  ;;  %v1470_v24 = vcombine.high %v1468_v16, %v1468_v16  ;;  %v1491_v19 = vrot.slane %v1469_v17, %v2439_v18 }
 0x583   :  { %v1484_v25 = vrot.slane %v1468_v16, %v2439_v18  ;;  %v1560_v26 = vpop.permute.xlu0 %1559 }
 0x584   :  { %v1514_v27 = vrot.slane %v1499_v21, %v2447_v23  ;;  %v1575_v28 = vadd.f32 %v1552_v2, %v1506_v22  ;;  %v1498_v29 = vrot.slane %v1470_v24, %v2439_v18  ;;  %v1501_v30 = vcombine.high %v1491_v19, %v1491_v19 }
 0x585   :  { %v1510_v32 = vrot.slane %v1491_v19, %v2447_v23  ;;  %v1522_v33 = vrot.slane %v1484_v25, %v2447_v23  ;;  %v1500_v34 = vcombine.high %v1484_v25, %v1484_v25 }
 0x586   :  { %v1526_v35 = vrot.slane %v1498_v29, %v2447_v23  ;;  %v1518_v36 = vrot.slane %v1501_v30, %v2447_v23  ;;  %v1502_v5 = vcombine.high %v1498_v29, %v1498_v29  ;;  %v1592_v37 = vadd.f32 %v1590_v13, %v1575_v28 }
 0x587   :  { %v1576_v38 = vadd.f32 %v1554_v3, %v1510_v32  ;;  %v1579_v39 = vadd.f32 %v1560_v26, %v1522_v33  ;;  %v1530_v40 = vrot.slane %v1500_v34, %v2447_v23  ;;  %v1564_v41 = vpop.permute.xlu0 %1563  ;;  %v1577_v6 = vadd.f32 %v1556_v4, %v1514_v27 }
 0x588   :  { %v1580_v18 = vadd.f32 %v1562_v31, %v1526_v35  ;;  %v1578_v42 = vadd.f32 %v1558_v15, %v1518_v36  ;;  %v1534_v43 = vrot.slane %v1502_v5, %v2447_v23  ;;  %vm1600_vm0 = vcmp.gt.f32.partialorder %v1592_v37, 0.0  ;;  %v1850_v36 = vld [vmem:[%s2657_s14] ss:$0 sm:$0xff]  ;;  %s2225_s14 = smov 5  }
 0x589   :  { %v1596_v8 = vadd.f32 %v1590_v13, %v1579_v39  ;;  %v1581_v10 = vadd.f32 %v1564_v41, %v1530_v40  ;;  %v1608_v44 = vmul.f32 0.01, %v1592_v37  ;;  %v1593_v46 = vadd.f32 %v1590_v13, %v1576_v38 }
 0x58a   :  { %v1595_v45 = vadd.f32 %v1590_v13, %v1578_v42  ;;  %v1594_v47 = vadd.f32 %v1590_v13, %v1577_v6  ;;  %v1597_v51 = vadd.f32 %v1590_v13, %v1580_v18  ;;  %v1582_v52 = vadd.f32 %v1566_v48, %v1534_v43 }
 0x58b   :  { %v1631_v49 = vpop.permute.xlu0 %1630  ;;  %v1616_v50 = vsel %vm1600_vm0, %v1592_v37, %v1608_v44  ;;  %v1612_v54 = vmul.f32 0.01, %v1596_v8  ;;  %v1598_v55 = vadd.f32 %v1590_v13, %v1581_v10  ;;  %vm1601_vm5 = vcmp.gt.f32.partialorder %v1593_v46, 0.0 }
 0x58c   :  { %v1611_v53 = vmul.f32 0.01, %v1595_v45  ;;  %v1633_v56 = vmul.f32 %v1631_v49, %v1616_v50  ;;  %v1609_v57 = vmul.f32 0.01, %v1593_v46  ;;  %vm1602_vm6 = vcmp.gt.f32.partialorder %v1594_v47, 0.0 }
 0x58d   :  { %v1610_v23 = vmul.f32 0.01, %v1594_v47  ;;  %vm1603_vm7 = vcmp.gt.f32.partialorder %v1595_v45, 0.0  ;;  %vm1604_vm8 = vcmp.gt.f32.partialorder %v1596_v8, 0.0  ;;  %v1613_v60 = vmul.f32 0.01, %v1597_v51 }
 0x58e   :  { %1649 = vrot.lane.b32.xlu1 %v1633_v56, %s2224_s12  ;;  %v1617_v58 = vsel %vm1601_vm5, %v1593_v46, %v1609_v57  ;;  %v1599_v62 = vadd.f32 %v1590_v13, %v1582_v52  ;;  %v1614_v63 = vmul.f32 0.01, %v1598_v55  ;;  %v1619_v1 = vsel %vm1603_vm7, %v1595_v45, %v1611_v53 }
 0x58f   :  { %v1618_v59 = vsel %vm1602_vm6, %v1594_v47, %v1610_v23  ;;  %v1634_v0 = vmul.f32 %v1631_v49, %v1617_v58  ;;  %v1620_v2 = vsel %vm1604_vm8, %v1596_v8, %v1612_v54  ;;  %vm1605_vm9 = vcmp.gt.f32.partialorder %v1597_v51, 0.0 }
 0x590   :  { %v1635_v61 = vmul.f32 %v1631_v49, %v1618_v59  ;;  %vm1606_vm3 = vcmp.gt.f32.partialorder %v1598_v55, 0.0  ;;  %v1636_v3 = vmul.f32 %v1631_v49, %v1619_v1  ;;  %v1637_v4 = vmul.f32 %v1631_v49, %v1620_v2  ;;  %v1772_v2 = vld [vmem:[%s2648_s5] sm:$0xff] }
 0x591   :  { %1651 = vrot.lane.b32.xlu0 %v1634_v0, %s2224_s12  ;;  %v1615_v7 = vmul.f32 0.01, %v1599_v62  ;;  %v1621_v11 = vsel %vm1605_vm9, %v1597_v51, %v1613_v60  ;;  %v1622_v12 = vsel %vm1606_vm3, %v1598_v55, %v1614_v63  ;;  %vm1607_vm4 = vcmp.gt.f32.partialorder %v1599_v62, 0.0  ;;  %v1697_v51 = vld [vmem:[#allocation10] sm:$0xff] }
 0x592   :  { %1653 = vrot.lane.b32.xlu1 %v1635_v61, %s2224_s12  ;;  %v1638_v15 = vmul.f32 %v1631_v49, %v1621_v11  ;;  %v1639_v16 = vmul.f32 %v1631_v49, %v1622_v12  ;;  %v2226_v0 = vmov 0  }
 0x593   :  { %v1623_v17 = vsel %vm1607_vm4, %v1599_v62, %v1615_v7  ;;  %1995 = vset.pattern.permute.xlu0 %v2226_v0 }
 0x594   :  { %v1640_v13 = vmul.f32 %v1631_v49, %v1623_v17 }
 0x595   :  { %1655 = vrot.lane.b32.xlu0 %v1636_v3, %s2224_s12 }
 0x596   :  { %1657 = vrot.lane.b32.xlu1 %v1637_v4, %s2224_s12 }
 0x599   :  { %1659 = vrot.lane.b32.xlu0 %v1638_v15, %s2224_s12 }
 0x59a   :  { %1661 = vrot.lane.b32.xlu1 %v1639_v16, %s2224_s12 }
 0x59d   :  { %1663 = vrot.lane.b32.xlu0 %v1640_v13, %s2224_s12 }
 0x600   :  { %v1650_v20 = vpop.permute.xlu1 %1649 }
 0x601   :  { %v1673_v21 = vsel %vm156_vm1, %v1650_v20, 0.0 }
 0x602   :  { %1674 = vadd.xlane.f32.xlu1 %v1673_v21 }
 0x603   :  { %v1652_v22 = vpop.permute.xlu0 %1651 }
 0x604   :  { %v1654_v24 = vpop.permute.xlu1 %1653  ;;  %v1676_v19 = vsel %vm156_vm1, %v1652_v22, 0.0 }
 0x605   :  { %1677 = vadd.xlane.f32.xlu0 %v1676_v19  ;;  %v1679_v25 = vsel %vm156_vm1, %v1654_v24, 0.0 }
 0x607   :  { %v1656_v26 = vpop.permute.xlu0 %1655 }
 0x608   :  { %v1658_v27 = vpop.permute.xlu1 %1657  ;;  %v1682_v31 = vsel %vm156_vm1, %v1656_v26, 0.0 }
 0x609   :  { %v1685_v28 = vsel %vm156_vm1, %v1658_v27, 0.0  ;;  %1680 = vadd.xlane.f32.xlu0 %v1679_v25 }
 0x60a   :  { %1686 = vadd.xlane.f32.xlu1 %v1685_v28 }
 0x60b   :  { %v1660_v29 = vpop.permute.xlu0 %1659 }
 0x60c   :  { %v1662_v30 = vpop.permute.xlu1 %1661  ;;  %v1688_v33 = vsel %vm156_vm1, %v1660_v29, 0.0 }
 0x60d   :  { %v1691_v32 = vsel %vm156_vm1, %v1662_v30, 0.0  ;;  %1683 = vadd.xlane.f32.xlu0 %v1682_v31 }
 0x60e   :  { %1692 = vadd.xlane.f32.xlu1 %v1691_v32 }
 0x60f   :  { %v1664_v34 = vpop.permute.xlu0 %1663 }
 0x610   :  { %v1694_v35 = vsel %vm156_vm1, %v1664_v34, 0.0  ;;  %vm1698_vm1 = vcmp.eq.s32.totalorder %v1697_v51, 0 }
 0x611   :  { %1689 = vadd.xlane.f32.xlu0 %v1688_v33 }
 0x615   :  { %1695 = vadd.xlane.f32.xlu0 %v1694_v35 }
 0x61f   :  { %1328 = vrot.lane.b32.xlu1 %v1850_v36, %s2213_s0 }
 0x68f   :  { %v1675_v5 = vpop.xlane.xlu1 %1674 }
 0x690   :  { %v1710_v40 = vrot.slane %v1675_v5, %v2437_v14 }
 0x692   :  { %v1678_v37 = vpop.xlane.xlu0 %1677 }
 0x693   :  { %v1714_v41 = vrot.slane %v1678_v37, %v2437_v14 }
 0x695   :  { %v1739_v43 = vsel %vm533_vm10, %v1714_v41, %v1710_v40  ;;  %vm1756_vm10 = vcmask 39936  }
 0x696   :  { %v1681_v38 = vpop.xlane.xlu0 %1680 }
 0x697   :  { %v1687_v39 = vpop.xlane.xlu1 %1686  ;;  %v1718_v6 = vrot.slane %v1681_v38, %v2437_v14 }
 0x698   :  { %v1726_v45 = vrot.slane %v1687_v39, %v2437_v14 }
 0x699   :  { %v1740_v10 = vsel %vm535_vm11, %v1718_v6, %v1739_v43  ;;  %vm1758_vm11 = vcmask 105472  }
 0x69a   :  { %v1684_v18 = vpop.xlane.xlu0 %1683 }
 0x69b   :  { %v1693_v42 = vpop.xlane.xlu1 %1692  ;;  %v1722_v8 = vrot.slane %v1684_v18, %v2437_v14 }
 0x69c   :  { %v1734_v53 = vrot.slane %v1693_v42, %v2437_v14 }
 0x69d   :  { %v1741_v44 = vsel %vm537_vm12, %v1722_v8, %v1740_v10  ;;  %vm1775_vm12 = vcmp.eq.f32.partialorder %v1772_v2, 1.0 }
 0x69e   :  { %v1690_v46 = vpop.xlane.xlu0 %1689  ;;  %v1742_v50 = vsel %vm539_vm13, %v1726_v45, %v1741_v44  ;;  %v1776_v3 = vsel %vm1775_vm12, 1, %v2226_v0 }
 0x69f   :  { %v1329_v47 = vpop.permute.xlu1 %1328  ;;  %v1730_v48 = vrot.slane %v1690_v46, %v2437_v14 }
 0x6a0   :  { %v1331_v49 = vadd.f32 %v1329_v47, %v2568_v9 }
 0x6a1   :  { %v1743_v52 = vsel %vm541_vm14, %v1730_v48, %v1742_v50 }
 0x6a2   :  { %1749 = vrot.lane.b32.xlu0 %v1331_v49, %s2213_s0  ;;  %v1696_v54 = vpop.xlane.xlu0 %1695  ;;  %v1744_v56 = vsel %vm543_vm15, %v1734_v53, %v1743_v52 }
 0x6a3   :  { %v1738_v55 = vrot.slane %v1696_v54, %v2437_v14 }
 0x6a5   :  { %v1745_v57 = vsel %vm545_vm2, %v1738_v55, %v1744_v56 }
 0x6a6   :  { %v1747_v23 = vsel %vm1698_vm1, -inf, %v1745_v57 }
 0x6a7   :  { %1753 = vrot.lane.b32.xlu1 %v1747_v23, %s2225_s14 }
 0x714   :  { %v1750_v9 = vpop.permute.xlu0 %1749 }
 0x719   :  { %v1754_v58 = vpop.permute.xlu1 %1753 }
 0x71a   :  { %v1757_v59 = vsel %vm1756_vm10, %v1750_v9, %v1754_v58 }
 0x71b   :  { %v1759_v60 = vsel %vm1758_vm11, %v1757_v59, -inf }
 0x71c   :  { %1760 = vmax.xlane.f32.xlu1 %v1759_v60 }
 0x7a9   :  { %v1761_v61 = vpop.xlane.xlu1 %1760 }
 0x7aa   :  { %v1762_v62 = vsub.f32 %v1757_v59, %v1761_v61 }
 0x7ac   :  { %v1763_v14 = vmul.f32 1.442695, %v1762_v62 }
 0x7ae   :  { %2020 = vpow2.f32 %v1763_v14 }
 0x7b8   :  { %v2021_v63 = vpop.eup %2020 }
 0x7b9   :  { %v1765_v1 = vsel %vm1758_vm11, %v2021_v63, 0.0 }
 0x7ba   :  { %1766 = vadd.xlane.f32.xlu0 %v1765_v1 }
 0x7d0   :  { %1778 = vperm.xlu0 %1995, %v1776_v3  }
 0x847   :  { %v1767_v4 = vpop.xlane.xlu0 %1766 }
 0x848   :  { %2022 = vlog2.f32 %v1767_v4 }
 0x849   :  { %2167 = shalt.err (!%p2164_p10)
}
 0x84a   :  { %s2168_s17 = scalar_lea.hbm %s2659_s16, 128 }
 0x84b   :  { %p2169_p11 = scmp.ne.s32.totalorder %s2659_s16, %s2168_s17  ;;  %p2172_p12 = scmp.lt.u32.totalorder %s2168_s17, %s2659_s16 }
 0x84d   :  { %p2174_p13 = pnand %p2172_p12, %p2169_p11 }
 0x84f   :  { %2177 = shalt.err (!%p2174_p13)
}
 0x850   :  { %1811 = dma.vmem_to_hbm [thread:$0]  %s1809_s18, 128, %s2659_s16, [#allocation15]   ;;  %v1779_v12 = vpop.permute.xlu0 %1778  ;;  %v1773_v13 = vsub.f32 1.0, %v1772_v2  ;;  %vm1786_vm14 = vcmask 7168   ;;  %vm1788_vm15 = vcmask 113664   ;;  %vm1790_vm2 = vcmask 130048  }
 0x851   :  { %vm1780_vm13 = vcmp.eq.s32.totalorder %v1779_v12, 1  ;;  %s2228_s7 = smov 1   ;;  %s2229_s8 = smov [#allocation13]  }
 0x852   :  { %v2023_v7 = vpop.eup %2022  ;;  %v1774_v20 = vmul.f32 -inf, %v1773_v13  ;;  %s1798_s26 = sshll.u32 %s2229_s8, 4  ;;  %s1799_s26 = int_to_ptr.vmem [resolvable:$true] %s1798_s26 }
 0x853   :  { %v1769_v11 = vmul.f32 0.6931472, %v2023_v7  ;;  %s2178_s16 = scalar_lea.vmem %s1799_s26, 128  ;;  %p2183_p1 = scmp.lt.s32.totalorder %s1799_s26, %s1799_s26 }
 0x854   :  { %p2179_p0 = scmp.ne.s32.totalorder %s1799_s26, %s2178_s16  ;;  %p2184_p2 = scmp.lt.s32.totalorder %s2178_s16, %s2178_s16 }
 0x855   :  { %v1770_v15 = vadd.f32 %v1769_v11, %v1761_v61 }
 0x856   :  { %p2185_p3 = por %p2184_p2, %p2183_p1 }
 0x857   :  { %v1771_v16 = vsub.f32 %v1757_v59, %v1770_v15 }
 0x858   :  { %p2186_p4 = pnand %p2185_p3, %p2179_p0 }
 0x859   :  { %v1781_v17 = vsel %vm1780_vm13, -inf, %v1771_v16 }
 0x85a   :  { %1783 = vrot.lane.b32.xlu1 %v1781_v17, %s2228_s7 }
 0x8cc   :  { %v1784_v21 = vpop.permute.xlu1 %1783 }
 0x8cd   :  { %v1787_v22 = vsel %vm1786_vm14, %v1774_v20, %v1784_v21 }
 0x8ce   :  { %v1789_v24 = vsel %vm1788_vm15, %v1787_v22, -inf }
 0x8cf   :  { %1791 = vst.msk [vmem:[#allocation13] sm:$0xff] %vm1790_vm2, %v1789_v24 }
 0x8d0   :  { %2189 = shalt.err (!%p2186_p4)
}
 0x8d1   :  { %s2665_s28 = sld [smem:[#allocation23_spill]] }
 0x8d7   :  { %s2190_s24 = scalar_lea.hbm %s2665_s28, 128 }
 0x8d8   :  { %p2191_p5 = scmp.ne.s32.totalorder %s2665_s28, %s2190_s24  ;;  %p2194_p6 = scmp.lt.u32.totalorder %s2190_s24, %s2665_s28 }
 0x8da   :  { %p2196_p7 = pnand %p2194_p6, %p2191_p5 }
 0x8dc   :  { %2199 = shalt.err (!%p2196_p7)
}
 0x8dd   :  { %1801 = dma.vmem_to_hbm [thread:$0]  %s1799_s26, 128, %s2665_s28, [#allocation4]  }
 0x8de   :  { %2208 = dma.done.wait [#allocation4], 128  }
 0x8df   :  { %2209 = vsyncadd [#allocation4], 4294967168 }
 0x8e0   :  { %2210 = dma.done.wait [#allocation15], 128  }
 0x8e1   :  { %2211 = vsyncadd [#allocation15], 4294967168 }
 0x8e2   :  { %1818 = vsyncpa [#allocation3], 1 }
 0x8e3   :  { %1819 = vsyncpa [#allocation6], 1 }
 0x8e4   :  { %1820 = vsyncpa [#allocation9], 1 }
 0x8e5   :  { %1821 = vsyncpa [#allocation12], 1 }
 0x8e6   :  { %1822 = vsyncpa [#allocation4], 1 }
 0x8e7   :  { %1823 = vsyncpa [#allocation15], 1 }

</bundles_post_ra>
